<compile_context>
chip_gen: v6e
topology: v6e:2x2x1
jax: 0.10.0
libtpu: 0.0.40
codegen_flags: <defaults>
</compile_context>

<pallas_src>
import jax
import jax.numpy as jnp
from jax.experimental import pallas as pl
from jax.experimental.pallas import tpu as pltpu


# ----------------------------------------------------------------------------
# Fused kernel factory (T, padded batch Bp, hidden Hd baked in via closure).
# ----------------------------------------------------------------------------
def _make_kernel(T, Bp, Hd):
    G = 4 * Hd                      # per-direction gate width
    f32 = jnp.float32
    bf16 = jnp.bfloat16

    def lstm_gates(gates, c):
        # gate column order per direction: [i, f, o, g] -> one fused sigmoid
        sig = jax.nn.sigmoid(gates[:, :3 * Hd])
        i_g = sig[:, 0 * Hd:1 * Hd]
        f_g = sig[:, 1 * Hd:2 * Hd]
        o_g = sig[:, 2 * Hd:3 * Hd]
        g_g = jnp.tanh(gates[:, 3 * Hd:])
        c_new = f_g * c + i_g * g_g
        return o_g * jnp.tanh(c_new), c_new

    def kernel(x_ref, m_ref,
               wih_ref, wblk_ref, b_ref,
               watt_ref, batt_ref,
               w1_ref, b1_ref, bns_ref, bnb_ref,
               w2_ref, b2_ref,
               out_ref,
               gin_sc, h_sc):
        # ---- Phase 1: hoisted input projections, both directions (bf16 MXU,
        #      f32 accumulate) ------------------------------------------------
        gin_sc[...] = (jnp.dot(x_ref[...], wih_ref[...],
                               preferred_element_type=f32) + b_ref[...])

        wblk = wblk_ref[...]        # (2Hd, 8Hd) block-diagonal, bf16, hoisted

        # ---- Phase 2: serial biLSTM; ONE fused h@W_hh matmul per step -------
        def step(t, carry):
            h_cat, cf, cb = carry
            rf = pl.multiple_of(t * Bp, Bp)                  # fwd timestep t
            rb = pl.multiple_of((T - 1 - t) * Bp, Bp)        # bwd timestep
            gf = gin_sc[pl.ds(rf, Bp), pl.ds(0, G)]          # (Bp, 4Hd)
            gb = gin_sc[pl.ds(rb, Bp), pl.ds(G, G)]          # (Bp, 4Hd)
            hh = jnp.dot(h_cat.astype(bf16), wblk,
                         preferred_element_type=f32)         # (Bp, 8Hd)
            hf, cf = lstm_gates(gf + hh[:, :G], cf)
            hb, cb = lstm_gates(gb + hh[:, G:], cb)
            h_sc[pl.ds(rf, Bp), pl.ds(0, Hd)] = hf
            h_sc[pl.ds(rb, Bp), pl.ds(Hd, Hd)] = hb
            return jnp.concatenate([hf, hb], axis=-1), cf, cb

        h0 = jnp.zeros((Bp, 2 * Hd), f32)
        c0 = jnp.zeros((Bp, Hd), f32)
        jax.lax.fori_loop(0, T, step, (h0, c0, c0),
                          unroll=True if T <= 16 else 8)

        # ---- Phase 3: mask + attention + hidden2tag head, full batch --------
        m_col = m_ref[...]                                   # (T*Bp, 1)
        Hm = h_sc[...] * m_col                               # masked [fw|bw]
        Mt = jnp.tanh(Hm)
        # Linear(2H, 1) as a lane reduction (XLU), not an N=1 matmul.
        logit = (jnp.sum(Mt * watt_ref[...], axis=-1, keepdims=True)
                 + batt_ref[...])                            # (T*Bp, 1)

        # softmax over T per batch column (row = t*Bp + b).  Subtracting the
        # global max is a constant shift within every batch group -> exact.
        e = jnp.exp(logit - jnp.max(logit, keepdims=True))
        hme = Hm * e                                         # Hm already masked
        den = e[0:Bp, :]
        num = hme[0:Bp, :]
        for t in range(1, T):                                # static-slice VPU adds
            den = den + e[t * Bp:(t + 1) * Bp, :]
            num = num + hme[t * Bp:(t + 1) * Bp, :]
        h_star = jnp.tanh(num * pl.reciprocal(den, approx=True))

        y = (jnp.dot(h_star.astype(bf16), w1_ref[...],
                     preferred_element_type=f32) + b1_ref[...])
        y = jnp.tanh(y * bns_ref[...] + bnb_ref[...])        # folded eval BN
        out_ref[...] = (jnp.dot(y.astype(bf16), w2_ref[...],
                                preferred_element_type=f32)
                        + b2_ref[...])                       # (Bp,128) lane-dense

    return kernel


# ----------------------------------------------------------------------------
# Wrapper: padding, weight fusion/casting, BN folding, pallas_call, unpadding.
# ----------------------------------------------------------------------------
@jax.jit
def relation_prediction_forward(x, m, params):
    """x: (T, B, E) time-major, m: (T, B) float mask -> scores (B, target)."""
    T, B, E = x.shape
    Hd = params['whh_f'].shape[0]
    G = 4 * Hd
    target = params['w2'].shape[-1]

    Bp = ((B + 7) // 8) * 8                   # batch padded to sublane multiple
    Tp = ((target + 127) // 128) * 128        # lane-dense classifier width
    bf16 = jnp.bfloat16

    # Pad batch, flatten to time-major 2D slabs; bf16 activations halve the DMA.
    xp = jnp.pad(x, ((0, 0), (0, Bp - B), (0, 0))).reshape(T * Bp, E).astype(bf16)
    mp = jnp.pad(m, ((0, 0), (0, Bp - B))).reshape(T * Bp, 1)

    # Fuse the two directions' input projections (N = 8H).
    wih = jnp.concatenate([params['wih_f'], params['wih_b']], axis=1).astype(bf16)
    bih = jnp.concatenate([params['b_f'], params['b_b']], axis=1)

    # Block-diagonal recurrent weight: [hf|hb] @ W_blk -> all 8H gates at once.
    zer = jnp.zeros((Hd, G), jnp.float32)
    wblk = jnp.concatenate(
        [jnp.concatenate([params['whh_f'], zer], axis=1),
         jnp.concatenate([zer, params['whh_b']], axis=1)], axis=0).astype(bf16)

    # Attention Linear(2H,1) as a (1, 2H) row for an in-kernel lane reduction.
    watt = params['w_att'].T

    # Fold eval-mode BatchNorm1d into a scale/shift.
    bns = params['bn_gamma'] * jax.lax.rsqrt(params['bn_var'] + 1e-5)
    bnb = params['bn_beta'] - params['bn_mean'] * bns

    # Zero-pad classifier weights to a 128-lane output.
    w2p = jnp.pad(params['w2'], ((0, 0), (0, Tp - target))).astype(bf16)
    b2p = jnp.pad(params['b2'], ((0, 0), (0, Tp - target)))
    w1 = params['w1'].astype(bf16)

    # Explicit scoped-VMEM budget: no grid, everything resident in VMEM.
    f32b, bf16b = 4, 2
    vmem_need = (T * Bp * 8 * Hd * f32b            # gin_sc
                 + T * Bp * 2 * Hd * f32b          # h history scratch
                 + T * Bp * E * bf16b              # x slab
                 + T * Bp * f32b                   # mask
                 + Bp * Tp * f32b                  # output
                 + (E + 2 * Hd) * 8 * Hd * bf16b   # wih + wblk
                 + (2 * Hd) * (2 * Hd + Tp) * bf16b)
    vmem_limit = int(min(max(2 * vmem_need + (4 << 20), 16 << 20), 96 << 20))

    out = pl.pallas_call(
        _make_kernel(T, Bp, Hd),
        out_shape=jax.ShapeDtypeStruct((Bp, Tp), jnp.float32),
        scratch_shapes=[
            pltpu.VMEM((T * Bp, 8 * Hd), jnp.float32),   # all-timestep gate inputs
            pltpu.VMEM((T * Bp, 2 * Hd), jnp.float32),   # [fw | bw] h history
        ],
        compiler_params=pltpu.CompilerParams(vmem_limit_bytes=vmem_limit),
    )(xp, mp, wih, wblk, bih, watt, params['b_att'],
      w1, params['b1'], bns, bnb, w2p, b2p)
    return out[:B, :target]


# ----------------------------------------------------------------------------
# Pure-JAX f32 reference (same parameter conventions) for a correctness check.
# ----------------------------------------------------------------------------
def _reference_forward(x, m, params):
    T, B, E = x.shape
    Hd = params['whh_f'].shape[0]

    def cell(x_t, h, c, wih, whh, b):
        gates = x_t @ wih + h @ whh + b
        i = jax.nn.sigmoid(gates[:, :Hd])
        f = jax.nn.sigmoid(gates[:, Hd:2 * Hd])
        o = jax.nn.sigmoid(gates[:, 2 * Hd:3 * Hd])
        g = jnp.tanh(gates[:, 3 * Hd:])
        c = f * c + i * g
        return o * jnp.tanh(c), c

    def run(xs, wih, whh, b):
        def sstep(carry, x_t):
            h, c = cell(x_t, carry[0], carry[1], wih, whh, b)
            return (h, c), h
        h0 = jnp.zeros((B, Hd), jnp.float32)
        _, hs = jax.lax.scan(sstep, (h0, h0), xs)
        return hs                                            # (T, B, Hd)

    fw = run(x, params['wih_f'], params['whh_f'], params['b_f'])
    bw = run(x[::-1], params['wih_b'], params['whh_b'], params['b_b'])[::-1]
    fw = fw * m[:, :, None]
    bw = bw * m[:, :, None]
    Hb = jnp.transpose(jnp.concatenate([fw, bw], -1), (1, 0, 2))   # (B, T, 2H)
    logit = jnp.tanh(Hb) @ params['w_att'] + params['b_att']       # (B, T, 1)
    a = jax.nn.softmax(logit[..., 0], axis=-1) * m.T               # (B, T)
    r = jnp.einsum('btd,bt->bd', Hb, a)
    h_star = jnp.tanh(r)
    y = h_star @ params['w1'] + params['b1']
    y = ((y - params['bn_mean']) * jax.lax.rsqrt(params['bn_var'] + 1e-5)
         * params['bn_gamma'] + params['bn_beta'])
    y = jnp.tanh(y)
    return y @ params['w2'] + params['b2']


# ----------------------------------------------------------------------------
# Deterministic synthetic parameters (no checkpoint).
# ----------------------------------------------------------------------------
def init_params(key, emb_dim, h_dim, target_size):
    ks = jax.random.split(key, 11)

    def u(k, shape, scale=0.08):
        return jax.random.uniform(k, shape, jnp.float32, -scale, scale)

    p = {}
    # LSTM weights stored pre-transposed ((in, 4H)/(H, 4H)).  Internal gate
    # column order is [i, f, o, g]; a PyTorch checkpoint ([i, f, g, o]) would
    # need its last two gate blocks swapped when loading.
    p['wih_f'] = u(ks[0], (emb_dim, 4 * h_dim))
    p['whh_f'] = u(ks[1], (h_dim, 4 * h_dim))
    p['b_f'] = u(ks[2], (1, 4 * h_dim))              # b_ih + b_hh combined
    p['wih_b'] = u(ks[3], (emb_dim, 4 * h_dim))
    p['whh_b'] = u(ks[4], (h_dim, 4 * h_dim))
    p['b_b'] = u(ks[5], (1, 4 * h_dim))
    # attention Linear(2H, 1) stored as (2H, 1); xavier_uniform as in module.
    lim = (6.0 / (2 * h_dim + 1)) ** 0.5
    p['w_att'] = jax.random.uniform(ks[6], (2 * h_dim, 1), jnp.float32, -lim, lim)
    p['b_att'] = jnp.zeros((1, 1), jnp.float32)
    # hidden2tag: Linear -> BatchNorm1d(eval) -> Tanh -> Dropout -> Linear.
    p['w1'] = u(ks[7], (2 * h_dim, 2 * h_dim))
    p['b1'] = u(ks[8], (1, 2 * h_dim))
    p['bn_gamma'] = jnp.ones((1, 2 * h_dim), jnp.float32)
    p['bn_beta'] = jnp.zeros((1, 2 * h_dim), jnp.float32)
    p['bn_mean'] = jnp.zeros((1, 2 * h_dim), jnp.float32)
    p['bn_var'] = jnp.ones((1, 2 * h_dim), jnp.float32)
    p['w2'] = u(ks[9], (2 * h_dim, target_size))
    p['b2'] = u(ks[10], (1, target_size))
    return p


if __name__ == "__main__":
    T, B, E, Hd, TARGET = 8, 2, 32, 32, 5
    key = jax.random.PRNGKey(0)
    kx, kp = jax.random.split(key, 2)

    x = jax.random.normal(kx, (T, B, E), jnp.float32)
    lengths = jnp.array([8, 5], jnp.int32)
    m = (jnp.arange(T)[:, None] < lengths[None, :]).astype(jnp.float32)  # (T, B)

    params = init_params(kp, E, Hd, TARGET)

    scores = relation_prediction_forward(x, m, params)
    jax.block_until_ready(scores)
    assert scores.shape == (B, TARGET)
    assert bool(jnp.all(jnp.isfinite(scores)))

    # Loose tolerance absorbs bf16 MXU operands vs. the f32 XLA reference.
    ref = _reference_forward(x, m, params)
    assert bool(jnp.allclose(scores, ref, rtol=5e-2, atol=5e-2))

    # TODO(synk): CNN branch (conv1/2/3 + fc1 + log_softmax) of the module is
    # not selected by this mode and is not implemented.
    print("KERNEL_OK")
</pallas_src>

<mosaic_0001>
module attributes {stable_mosaic.version = 11 : i64} {
  func.func @kernel(%arg0: memref<64x32xbf16, #tpu.memory_space<vmem>>, %arg1: memref<64x1xf32, #tpu.memory_space<vmem>>, %arg2: memref<32x256xbf16, #tpu.memory_space<vmem>>, %arg3: memref<64x256xbf16, #tpu.memory_space<vmem>>, %arg4: memref<1x256xf32, #tpu.memory_space<vmem>>, %arg5: memref<1x64xf32, #tpu.memory_space<vmem>>, %arg6: memref<1x1xf32, #tpu.memory_space<vmem>>, %arg7: memref<64x64xbf16, #tpu.memory_space<vmem>>, %arg8: memref<1x64xf32, #tpu.memory_space<vmem>>, %arg9: memref<1x64xf32, #tpu.memory_space<vmem>>, %arg10: memref<1x64xf32, #tpu.memory_space<vmem>>, %arg11: memref<64x128xbf16, #tpu.memory_space<vmem>>, %arg12: memref<1x128xf32, #tpu.memory_space<vmem>>, %arg13: memref<8x128xf32, #tpu.memory_space<vmem>>, %arg14: memref<64x256xf32, #tpu.memory_space<vmem>>, %arg15: memref<64x64xf32, #tpu.memory_space<vmem>>) attributes {dimension_semantics = [], scalar_prefetch = 0 : i64, scratch_operands = 2 : i64, tpu.core_type = #tpu.core_type<tc>} {
    %c0 = arith.constant 0 : index
    %c0_0 = arith.constant 0 : index
    %0 = vector.load %arg0[%c0, %c0_0] : memref<64x32xbf16, #tpu.memory_space<vmem>>, vector<64x32xbf16>
    %c0_1 = arith.constant 0 : index
    %c0_2 = arith.constant 0 : index
    %1 = vector.load %arg2[%c0_1, %c0_2] : memref<32x256xbf16, #tpu.memory_space<vmem>>, vector<32x256xbf16>
    %cst = arith.constant dense<0.000000e+00> : vector<64x256xf32>
    %2 = tpu.matmul %0, %1, %cst {dimension_numbers = #tpu.dot_dimension_numbers<[1], [0], [0], [1], [0, 0, 1, 1], [], []>} : vector<64x32xbf16>, vector<32x256xbf16>, vector<64x256xf32> -> vector<64x256xf32>
    %c0_3 = arith.constant 0 : index
    %c0_4 = arith.constant 0 : index
    %3 = vector.load %arg4[%c0_3, %c0_4] : memref<1x256xf32, #tpu.memory_space<vmem>>, vector<1x256xf32>
    %4 = vector.broadcast %3 : vector<1x256xf32> to vector<64x256xf32>
    %5 = arith.addf %2, %4 : vector<64x256xf32>
    %c0_5 = arith.constant 0 : index
    %c0_6 = arith.constant 0 : index
    %6 = vector.load %arg14[%c0_5, %c0_6] : memref<64x256xf32, #tpu.memory_space<vmem>>, vector<64x256xf32>
    tpu.vector_store %arg14[%c0_5, %c0_6], %5 {strides = array<i32>} : memref<64x256xf32, #tpu.memory_space<vmem>>, vector<64x256xf32>,
    %c0_7 = arith.constant 0 : index
    %c0_8 = arith.constant 0 : index
    %7 = vector.load %arg3[%c0_7, %c0_8] : memref<64x256xbf16, #tpu.memory_space<vmem>>, vector<64x256xbf16>
    %cst_9 = arith.constant 0.000000e+00 : f32
    %8 = vector.broadcast %cst_9 : f32 to vector<8x64xf32>
    %cst_10 = arith.constant 0.000000e+00 : f32
    %9 = vector.broadcast %cst_10 : f32 to vector<8x32xf32>
    %c0_i32 = arith.constant 0 : i32
    %c8_i32 = arith.constant 8 : i32
    %10 = arith.muli %c0_i32, %c8_i32 : i32
    %11 = tpu.assume_multiple %10, 8 : i32
    %c7_i32 = arith.constant 7 : i32
    %12 = arith.subi %c7_i32, %c0_i32 : i32
    %c8_i32_11 = arith.constant 8 : i32
    %13 = arith.muli %12, %c8_i32_11 : i32
    %14 = tpu.assume_multiple %13, 8 : i32
    %15 = arith.index_cast %11 : i32 to index
    %c0_12 = arith.constant 0 : index
    %16 = vector.load %arg14[%15, %c0_12] : memref<64x256xf32, #tpu.memory_space<vmem>>, vector<8x128xf32>
    %17 = arith.index_cast %14 : i32 to index
    %c128 = arith.constant 128 : index
    %18 = vector.load %arg14[%17, %c128] : memref<64x256xf32, #tpu.memory_space<vmem>>, vector<8x128xf32>
    %19 = arith.truncf %8 : vector<8x64xf32> to vector<8x64xbf16>
    %cst_13 = arith.constant dense<0.000000e+00> : vector<8x256xf32>
    %20 = tpu.matmul %19, %7, %cst_13 {dimension_numbers = #tpu.dot_dimension_numbers<[1], [0], [0], [1], [0, 0, 1, 1], [], []>} : vector<8x64xbf16>, vector<64x256xbf16>, vector<8x256xf32> -> vector<8x256xf32>
    %21 = vector.extract_strided_slice %20 {offsets = [0, 0], sizes = [8, 128], strides = [1, 1]} : vector<8x256xf32> to vector<8x128xf32>
    %22 = arith.addf %16, %21 : vector<8x128xf32>
    %23 = vector.extract_strided_slice %22 {offsets = [0, 0], sizes = [8, 96], strides = [1, 1]} : vector<8x128xf32> to vector<8x96xf32>
    %24 = arith.negf %23 : vector<8x96xf32>
    %25 = math.exp %24 : vector<8x96xf32>
    %cst_14 = arith.constant 1.000000e+00 : f32
    %26 = vector.broadcast %cst_14 : f32 to vector<8x96xf32>
    %27 = arith.addf %26, %25 : vector<8x96xf32>
    %28 = arith.divf %26, %27 : vector<8x96xf32>
    %29 = vector.extract_strided_slice %28 {offsets = [0, 0], sizes = [8, 32], strides = [1, 1]} : vector<8x96xf32> to vector<8x32xf32>
    %30 = vector.extract_strided_slice %28 {offsets = [0, 32], sizes = [8, 32], strides = [1, 1]} : vector<8x96xf32> to vector<8x32xf32>
    %31 = vector.extract_strided_slice %28 {offsets = [0, 64], sizes = [8, 32], strides = [1, 1]} : vector<8x96xf32> to vector<8x32xf32>
    %32 = vector.extract_strided_slice %22 {offsets = [0, 96], sizes = [8, 32], strides = [1, 1]} : vector<8x128xf32> to vector<8x32xf32>
    %33 = math.tanh %32 : vector<8x32xf32>
    %34 = arith.mulf %30, %9 : vector<8x32xf32>
    %35 = arith.mulf %29, %33 : vector<8x32xf32>
    %36 = arith.addf %34, %35 : vector<8x32xf32>
    %37 = math.tanh %36 : vector<8x32xf32>
    %38 = arith.mulf %31, %37 : vector<8x32xf32>
    %39 = vector.extract_strided_slice %20 {offsets = [0, 128], sizes = [8, 128], strides = [1, 1]} : vector<8x256xf32> to vector<8x128xf32>
    %40 = arith.addf %18, %39 : vector<8x128xf32>
    %41 = vector.extract_strided_slice %40 {offsets = [0, 0], sizes = [8, 96], strides = [1, 1]} : vector<8x128xf32> to vector<8x96xf32>
    %42 = arith.negf %41 : vector<8x96xf32>
    %43 = math.exp %42 : vector<8x96xf32>
    %cst_15 = arith.constant 1.000000e+00 : f32
    %44 = vector.broadcast %cst_15 : f32 to vector<8x96xf32>
    %45 = arith.addf %44, %43 : vector<8x96xf32>
    %46 = arith.divf %44, %45 : vector<8x96xf32>
    %47 = vector.extract_strided_slice %46 {offsets = [0, 0], sizes = [8, 32], strides = [1, 1]} : vector<8x96xf32> to vector<8x32xf32>
    %48 = vector.extract_strided_slice %46 {offsets = [0, 32], sizes = [8, 32], strides = [1, 1]} : vector<8x96xf32> to vector<8x32xf32>
    %49 = vector.extract_strided_slice %46 {offsets = [0, 64], sizes = [8, 32], strides = [1, 1]} : vector<8x96xf32> to vector<8x32xf32>
    %50 = vector.extract_strided_slice %40 {offsets = [0, 96], sizes = [8, 32], strides = [1, 1]} : vector<8x128xf32> to vector<8x32xf32>
    %51 = math.tanh %50 : vector<8x32xf32>
    %52 = arith.mulf %48, %9 : vector<8x32xf32>
    %53 = arith.mulf %47, %51 : vector<8x32xf32>
    %54 = arith.addf %52, %53 : vector<8x32xf32>
    %55 = math.tanh %54 : vector<8x32xf32>
    %56 = arith.mulf %49, %55 : vector<8x32xf32>
    %57 = arith.index_cast %11 : i32 to index
    %c0_16 = arith.constant 0 : index
    %58 = vector.load %arg15[%57, %c0_16] : memref<64x64xf32, #tpu.memory_space<vmem>>, vector<8x32xf32>
    tpu.vector_store %arg15[%57, %c0_16], %38 {strides = array<i32>} : memref<64x64xf32, #tpu.memory_space<vmem>>, vector<8x32xf32>,
    %59 = arith.index_cast %14 : i32 to index
    %c32 = arith.constant 32 : index
    %60 = vector.load %arg15[%59, %c32] : memref<64x64xf32, #tpu.memory_space<vmem>>, vector<8x32xf32>
    tpu.vector_store %arg15[%59, %c32], %56 {strides = array<i32>} : memref<64x64xf32, #tpu.memory_space<vmem>>, vector<8x32xf32>,
    %61 = tpu.concatenate %38, %56 in 1 : vector<8x32xf32>, vector<8x32xf32> -> vector<8x64xf32>
    %c1_i32 = arith.constant 1 : i32
    %c8_i32_17 = arith.constant 8 : i32
    %62 = arith.muli %c1_i32, %c8_i32_17 : i32
    %63 = tpu.assume_multiple %62, 8 : i32
    %c7_i32_18 = arith.constant 7 : i32
    %64 = arith.subi %c7_i32_18, %c1_i32 : i32
    %c8_i32_19 = arith.constant 8 : i32
    %65 = arith.muli %64, %c8_i32_19 : i32
    %66 = tpu.assume_multiple %65, 8 : i32
    %67 = arith.index_cast %63 : i32 to index
    %c0_20 = arith.constant 0 : index
    %68 = vector.load %arg14[%67, %c0_20] : memref<64x256xf32, #tpu.memory_space<vmem>>, vector<8x128xf32>
    %69 = arith.index_cast %66 : i32 to index
    %c128_21 = arith.constant 128 : index
    %70 = vector.load %arg14[%69, %c128_21] : memref<64x256xf32, #tpu.memory_space<vmem>>, vector<8x128xf32>
    %71 = arith.truncf %61 : vector<8x64xf32> to vector<8x64xbf16>
    %cst_22 = arith.constant dense<0.000000e+00> : vector<8x256xf32>
    %72 = tpu.matmul %71, %7, %cst_22 {dimension_numbers = #tpu.dot_dimension_numbers<[1], [0], [0], [1], [0, 0, 1, 1], [], []>} : vector<8x64xbf16>, vector<64x256xbf16>, vector<8x256xf32> -> vector<8x256xf32>
    %73 = vector.extract_strided_slice %72 {offsets = [0, 0], sizes = [8, 128], strides = [1, 1]} : vector<8x256xf32> to vector<8x128xf32>
    %74 = arith.addf %68, %73 : vector<8x128xf32>
    %75 = vector.extract_strided_slice %74 {offsets = [0, 0], sizes = [8, 96], strides = [1, 1]} : vector<8x128xf32> to vector<8x96xf32>
    %76 = arith.negf %75 : vector<8x96xf32>
    %77 = math.exp %76 : vector<8x96xf32>
    %cst_23 = arith.constant 1.000000e+00 : f32
    %78 = vector.broadcast %cst_23 : f32 to vector<8x96xf32>
    %79 = arith.addf %78, %77 : vector<8x96xf32>
    %80 = arith.divf %78, %79 : vector<8x96xf32>
    %81 = vector.extract_strided_slice %80 {offsets = [0, 0], sizes = [8, 32], strides = [1, 1]} : vector<8x96xf32> to vector<8x32xf32>
    %82 = vector.extract_strided_slice %80 {offsets = [0, 32], sizes = [8, 32], strides = [1, 1]} : vector<8x96xf32> to vector<8x32xf32>
    %83 = vector.extract_strided_slice %80 {offsets = [0, 64], sizes = [8, 32], strides = [1, 1]} : vector<8x96xf32> to vector<8x32xf32>
    %84 = vector.extract_strided_slice %74 {offsets = [0, 96], sizes = [8, 32], strides = [1, 1]} : vector<8x128xf32> to vector<8x32xf32>
    %85 = math.tanh %84 : vector<8x32xf32>
    %86 = arith.mulf %82, %36 : vector<8x32xf32>
    %87 = arith.mulf %81, %85 : vector<8x32xf32>
    %88 = arith.addf %86, %87 : vector<8x32xf32>
    %89 = math.tanh %88 : vector<8x32xf32>
    %90 = arith.mulf %83, %89 : vector<8x32xf32>
    %91 = vector.extract_strided_slice %72 {offsets = [0, 128], sizes = [8, 128], strides = [1, 1]} : vector<8x256xf32> to vector<8x128xf32>
    %92 = arith.addf %70, %91 : vector<8x128xf32>
    %93 = vector.extract_strided_slice %92 {offsets = [0, 0], sizes = [8, 96], strides = [1, 1]} : vector<8x128xf32> to vector<8x96xf32>
    %94 = arith.negf %93 : vector<8x96xf32>
    %95 = math.exp %94 : vector<8x96xf32>
    %cst_24 = arith.constant 1.000000e+00 : f32
    %96 = vector.broadcast %cst_24 : f32 to vector<8x96xf32>
    %97 = arith.addf %96, %95 : vector<8x96xf32>
    %98 = arith.divf %96, %97 : vector<8x96xf32>
    %99 = vector.extract_strided_slice %98 {offsets = [0, 0], sizes = [8, 32], strides = [1, 1]} : vector<8x96xf32> to vector<8x32xf32>
    %100 = vector.extract_strided_slice %98 {offsets = [0, 32], sizes = [8, 32], strides = [1, 1]} : vector<8x96xf32> to vector<8x32xf32>
    %101 = vector.extract_strided_slice %98 {offsets = [0, 64], sizes = [8, 32], strides = [1, 1]} : vector<8x96xf32> to vector<8x32xf32>
    %102 = vector.extract_strided_slice %92 {offsets = [0, 96], sizes = [8, 32], strides = [1, 1]} : vector<8x128xf32> to vector<8x32xf32>
    %103 = math.tanh %102 : vector<8x32xf32>
    %104 = arith.mulf %100, %54 : vector<8x32xf32>
    %105 = arith.mulf %99, %103 : vector<8x32xf32>
    %106 = arith.addf %104, %105 : vector<8x32xf32>
    %107 = math.tanh %106 : vector<8x32xf32>
    %108 = arith.mulf %101, %107 : vector<8x32xf32>
    %109 = arith.index_cast %63 : i32 to index
    %c0_25 = arith.constant 0 : index
    %110 = vector.load %arg15[%109, %c0_25] : memref<64x64xf32, #tpu.memory_space<vmem>>, vector<8x32xf32>
    tpu.vector_store %arg15[%109, %c0_25], %90 {strides = array<i32>} : memref<64x64xf32, #tpu.memory_space<vmem>>, vector<8x32xf32>,
    %111 = arith.index_cast %66 : i32 to index
    %c32_26 = arith.constant 32 : index
    %112 = vector.load %arg15[%111, %c32_26] : memref<64x64xf32, #tpu.memory_space<vmem>>, vector<8x32xf32>
    tpu.vector_store %arg15[%111, %c32_26], %108 {strides = array<i32>} : memref<64x64xf32, #tpu.memory_space<vmem>>, vector<8x32xf32>,
    %113 = tpu.concatenate %90, %108 in 1 : vector<8x32xf32>, vector<8x32xf32> -> vector<8x64xf32>
    %c2_i32 = arith.constant 2 : i32
    %c8_i32_27 = arith.constant 8 : i32
    %114 = arith.muli %c2_i32, %c8_i32_27 : i32
    %115 = tpu.assume_multiple %114, 8 : i32
    %c7_i32_28 = arith.constant 7 : i32
    %116 = arith.subi %c7_i32_28, %c2_i32 : i32
    %c8_i32_29 = arith.constant 8 : i32
    %117 = arith.muli %116, %c8_i32_29 : i32
    %118 = tpu.assume_multiple %117, 8 : i32
    %119 = arith.index_cast %115 : i32 to index
    %c0_30 = arith.constant 0 : index
    %120 = vector.load %arg14[%119, %c0_30] : memref<64x256xf32, #tpu.memory_space<vmem>>, vector<8x128xf32>
    %121 = arith.index_cast %118 : i32 to index
    %c128_31 = arith.constant 128 : index
    %122 = vector.load %arg14[%121, %c128_31] : memref<64x256xf32, #tpu.memory_space<vmem>>, vector<8x128xf32>
    %123 = arith.truncf %113 : vector<8x64xf32> to vector<8x64xbf16>
    %cst_32 = arith.constant dense<0.000000e+00> : vector<8x256xf32>
    %124 = tpu.matmul %123, %7, %cst_32 {dimension_numbers = #tpu.dot_dimension_numbers<[1], [0], [0], [1], [0, 0, 1, 1], [], []>} : vector<8x64xbf16>, vector<64x256xbf16>, vector<8x256xf32> -> vector<8x256xf32>
    %125 = vector.extract_strided_slice %124 {offsets = [0, 0], sizes = [8, 128], strides = [1, 1]} : vector<8x256xf32> to vector<8x128xf32>
    %126 = arith.addf %120, %125 : vector<8x128xf32>
    %127 = vector.extract_strided_slice %126 {offsets = [0, 0], sizes = [8, 96], strides = [1, 1]} : vector<8x128xf32> to vector<8x96xf32>
    %128 = arith.negf %127 : vector<8x96xf32>
    %129 = math.exp %128 : vector<8x96xf32>
    %cst_33 = arith.constant 1.000000e+00 : f32
    %130 = vector.broadcast %cst_33 : f32 to vector<8x96xf32>
    %131 = arith.addf %130, %129 : vector<8x96xf32>
    %132 = arith.divf %130, %131 : vector<8x96xf32>
    %133 = vector.extract_strided_slice %132 {offsets = [0, 0], sizes = [8, 32], strides = [1, 1]} : vector<8x96xf32> to vector<8x32xf32>
    %134 = vector.extract_strided_slice %132 {offsets = [0, 32], sizes = [8, 32], strides = [1, 1]} : vector<8x96xf32> to vector<8x32xf32>
    %135 = vector.extract_strided_slice %132 {offsets = [0, 64], sizes = [8, 32], strides = [1, 1]} : vector<8x96xf32> to vector<8x32xf32>
    %136 = vector.extract_strided_slice %126 {offsets = [0, 96], sizes = [8, 32], strides = [1, 1]} : vector<8x128xf32> to vector<8x32xf32>
    %137 = math.tanh %136 : vector<8x32xf32>
    %138 = arith.mulf %134, %88 : vector<8x32xf32>
    %139 = arith.mulf %133, %137 : vector<8x32xf32>
    %140 = arith.addf %138, %139 : vector<8x32xf32>
    %141 = math.tanh %140 : vector<8x32xf32>
    %142 = arith.mulf %135, %141 : vector<8x32xf32>
    %143 = vector.extract_strided_slice %124 {offsets = [0, 128], sizes = [8, 128], strides = [1, 1]} : vector<8x256xf32> to vector<8x128xf32>
    %144 = arith.addf %122, %143 : vector<8x128xf32>
    %145 = vector.extract_strided_slice %144 {offsets = [0, 0], sizes = [8, 96], strides = [1, 1]} : vector<8x128xf32> to vector<8x96xf32>
    %146 = arith.negf %145 : vector<8x96xf32>
    %147 = math.exp %146 : vector<8x96xf32>
    %cst_34 = arith.constant 1.000000e+00 : f32
    %148 = vector.broadcast %cst_34 : f32 to vector<8x96xf32>
    %149 = arith.addf %148, %147 : vector<8x96xf32>
    %150 = arith.divf %148, %149 : vector<8x96xf32>
    %151 = vector.extract_strided_slice %150 {offsets = [0, 0], sizes = [8, 32], strides = [1, 1]} : vector<8x96xf32> to vector<8x32xf32>
    %152 = vector.extract_strided_slice %150 {offsets = [0, 32], sizes = [8, 32], strides = [1, 1]} : vector<8x96xf32> to vector<8x32xf32>
    %153 = vector.extract_strided_slice %150 {offsets = [0, 64], sizes = [8, 32], strides = [1, 1]} : vector<8x96xf32> to vector<8x32xf32>
    %154 = vector.extract_strided_slice %144 {offsets = [0, 96], sizes = [8, 32], strides = [1, 1]} : vector<8x128xf32> to vector<8x32xf32>
    %155 = math.tanh %154 : vector<8x32xf32>
    %156 = arith.mulf %152, %106 : vector<8x32xf32>
    %157 = arith.mulf %151, %155 : vector<8x32xf32>
    %158 = arith.addf %156, %157 : vector<8x32xf32>
    %159 = math.tanh %158 : vector<8x32xf32>
    %160 = arith.mulf %153, %159 : vector<8x32xf32>
    %161 = arith.index_cast %115 : i32 to index
    %c0_35 = arith.constant 0 : index
    %162 = vector.load %arg15[%161, %c0_35] : memref<64x64xf32, #tpu.memory_space<vmem>>, vector<8x32xf32>
    tpu.vector_store %arg15[%161, %c0_35], %142 {strides = array<i32>} : memref<64x64xf32, #tpu.memory_space<vmem>>, vector<8x32xf32>,
    %163 = arith.index_cast %118 : i32 to index
    %c32_36 = arith.constant 32 : index
    %164 = vector.load %arg15[%163, %c32_36] : memref<64x64xf32, #tpu.memory_space<vmem>>, vector<8x32xf32>
    tpu.vector_store %arg15[%163, %c32_36], %160 {strides = array<i32>} : memref<64x64xf32, #tpu.memory_space<vmem>>, vector<8x32xf32>,
    %165 = tpu.concatenate %142, %160 in 1 : vector<8x32xf32>, vector<8x32xf32> -> vector<8x64xf32>
    %c3_i32 = arith.constant 3 : i32
    %c8_i32_37 = arith.constant 8 : i32
    %166 = arith.muli %c3_i32, %c8_i32_37 : i32
    %167 = tpu.assume_multiple %166, 8 : i32
    %c7_i32_38 = arith.constant 7 : i32
    %168 = arith.subi %c7_i32_38, %c3_i32 : i32
    %c8_i32_39 = arith.constant 8 : i32
    %169 = arith.muli %168, %c8_i32_39 : i32
    %170 = tpu.assume_multiple %169, 8 : i32
    %171 = arith.index_cast %167 : i32 to index
    %c0_40 = arith.constant 0 : index
    %172 = vector.load %arg14[%171, %c0_40] : memref<64x256xf32, #tpu.memory_space<vmem>>, vector<8x128xf32>
    %173 = arith.index_cast %170 : i32 to index
    %c128_41 = arith.constant 128 : index
    %174 = vector.load %arg14[%173, %c128_41] : memref<64x256xf32, #tpu.memory_space<vmem>>, vector<8x128xf32>
    %175 = arith.truncf %165 : vector<8x64xf32> to vector<8x64xbf16>
    %cst_42 = arith.constant dense<0.000000e+00> : vector<8x256xf32>
    %176 = tpu.matmul %175, %7, %cst_42 {dimension_numbers = #tpu.dot_dimension_numbers<[1], [0], [0], [1], [0, 0, 1, 1], [], []>} : vector<8x64xbf16>, vector<64x256xbf16>, vector<8x256xf32> -> vector<8x256xf32>
    %177 = vector.extract_strided_slice %176 {offsets = [0, 0], sizes = [8, 128], strides = [1, 1]} : vector<8x256xf32> to vector<8x128xf32>
    %178 = arith.addf %172, %177 : vector<8x128xf32>
    %179 = vector.extract_strided_slice %178 {offsets = [0, 0], sizes = [8, 96], strides = [1, 1]} : vector<8x128xf32> to vector<8x96xf32>
    %180 = arith.negf %179 : vector<8x96xf32>
    %181 = math.exp %180 : vector<8x96xf32>
    %cst_43 = arith.constant 1.000000e+00 : f32
    %182 = vector.broadcast %cst_43 : f32 to vector<8x96xf32>
    %183 = arith.addf %182, %181 : vector<8x96xf32>
    %184 = arith.divf %182, %183 : vector<8x96xf32>
    %185 = vector.extract_strided_slice %184 {offsets = [0, 0], sizes = [8, 32], strides = [1, 1]} : vector<8x96xf32> to vector<8x32xf32>
    %186 = vector.extract_strided_slice %184 {offsets = [0, 32], sizes = [8, 32], strides = [1, 1]} : vector<8x96xf32> to vector<8x32xf32>
    %187 = vector.extract_strided_slice %184 {offsets = [0, 64], sizes = [8, 32], strides = [1, 1]} : vector<8x96xf32> to vector<8x32xf32>
    %188 = vector.extract_strided_slice %178 {offsets = [0, 96], sizes = [8, 32], strides = [1, 1]} : vector<8x128xf32> to vector<8x32xf32>
    %189 = math.tanh %188 : vector<8x32xf32>
    %190 = arith.mulf %186, %140 : vector<8x32xf32>
    %191 = arith.mulf %185, %189 : vector<8x32xf32>
    %192 = arith.addf %190, %191 : vector<8x32xf32>
    %193 = math.tanh %192 : vector<8x32xf32>
    %194 = arith.mulf %187, %193 : vector<8x32xf32>
    %195 = vector.extract_strided_slice %176 {offsets = [0, 128], sizes = [8, 128], strides = [1, 1]} : vector<8x256xf32> to vector<8x128xf32>
    %196 = arith.addf %174, %195 : vector<8x128xf32>
    %197 = vector.extract_strided_slice %196 {offsets = [0, 0], sizes = [8, 96], strides = [1, 1]} : vector<8x128xf32> to vector<8x96xf32>
    %198 = arith.negf %197 : vector<8x96xf32>
    %199 = math.exp %198 : vector<8x96xf32>
    %cst_44 = arith.constant 1.000000e+00 : f32
    %200 = vector.broadcast %cst_44 : f32 to vector<8x96xf32>
    %201 = arith.addf %200, %199 : vector<8x96xf32>
    %202 = arith.divf %200, %201 : vector<8x96xf32>
    %203 = vector.extract_strided_slice %202 {offsets = [0, 0], sizes = [8, 32], strides = [1, 1]} : vector<8x96xf32> to vector<8x32xf32>
    %204 = vector.extract_strided_slice %202 {offsets = [0, 32], sizes = [8, 32], strides = [1, 1]} : vector<8x96xf32> to vector<8x32xf32>
    %205 = vector.extract_strided_slice %202 {offsets = [0, 64], sizes = [8, 32], strides = [1, 1]} : vector<8x96xf32> to vector<8x32xf32>
    %206 = vector.extract_strided_slice %196 {offsets = [0, 96], sizes = [8, 32], strides = [1, 1]} : vector<8x128xf32> to vector<8x32xf32>
    %207 = math.tanh %206 : vector<8x32xf32>
    %208 = arith.mulf %204, %158 : vector<8x32xf32>
    %209 = arith.mulf %203, %207 : vector<8x32xf32>
    %210 = arith.addf %208, %209 : vector<8x32xf32>
    %211 = math.tanh %210 : vector<8x32xf32>
    %212 = arith.mulf %205, %211 : vector<8x32xf32>
    %213 = arith.index_cast %167 : i32 to index
    %c0_45 = arith.constant 0 : index
    %214 = vector.load %arg15[%213, %c0_45] : memref<64x64xf32, #tpu.memory_space<vmem>>, vector<8x32xf32>
    tpu.vector_store %arg15[%213, %c0_45], %194 {strides = array<i32>} : memref<64x64xf32, #tpu.memory_space<vmem>>, vector<8x32xf32>,
    %215 = arith.index_cast %170 : i32 to index
    %c32_46 = arith.constant 32 : index
    %216 = vector.load %arg15[%215, %c32_46] : memref<64x64xf32, #tpu.memory_space<vmem>>, vector<8x32xf32>
    tpu.vector_store %arg15[%215, %c32_46], %212 {strides = array<i32>} : memref<64x64xf32, #tpu.memory_space<vmem>>, vector<8x32xf32>,
    %217 = tpu.concatenate %194, %212 in 1 : vector<8x32xf32>, vector<8x32xf32> -> vector<8x64xf32>
    %c4_i32 = arith.constant 4 : i32
    %c8_i32_47 = arith.constant 8 : i32
    %218 = arith.muli %c4_i32, %c8_i32_47 : i32
    %219 = tpu.assume_multiple %218, 8 : i32
    %c7_i32_48 = arith.constant 7 : i32
    %220 = arith.subi %c7_i32_48, %c4_i32 : i32
    %c8_i32_49 = arith.constant 8 : i32
    %221 = arith.muli %220, %c8_i32_49 : i32
    %222 = tpu.assume_multiple %221, 8 : i32
    %223 = arith.index_cast %219 : i32 to index
    %c0_50 = arith.constant 0 : index
    %224 = vector.load %arg14[%223, %c0_50] : memref<64x256xf32, #tpu.memory_space<vmem>>, vector<8x128xf32>
    %225 = arith.index_cast %222 : i32 to index
    %c128_51 = arith.constant 128 : index
    %226 = vector.load %arg14[%225, %c128_51] : memref<64x256xf32, #tpu.memory_space<vmem>>, vector<8x128xf32>
    %227 = arith.truncf %217 : vector<8x64xf32> to vector<8x64xbf16>
    %cst_52 = arith.constant dense<0.000000e+00> : vector<8x256xf32>
    %228 = tpu.matmul %227, %7, %cst_52 {dimension_numbers = #tpu.dot_dimension_numbers<[1], [0], [0], [1], [0, 0, 1, 1], [], []>} : vector<8x64xbf16>, vector<64x256xbf16>, vector<8x256xf32> -> vector<8x256xf32>
    %229 = vector.extract_strided_slice %228 {offsets = [0, 0], sizes = [8, 128], strides = [1, 1]} : vector<8x256xf32> to vector<8x128xf32>
    %230 = arith.addf %224, %229 : vector<8x128xf32>
    %231 = vector.extract_strided_slice %230 {offsets = [0, 0], sizes = [8, 96], strides = [1, 1]} : vector<8x128xf32> to vector<8x96xf32>
    %232 = arith.negf %231 : vector<8x96xf32>
    %233 = math.exp %232 : vector<8x96xf32>
    %cst_53 = arith.constant 1.000000e+00 : f32
    %234 = vector.broadcast %cst_53 : f32 to vector<8x96xf32>
    %235 = arith.addf %234, %233 : vector<8x96xf32>
    %236 = arith.divf %234, %235 : vector<8x96xf32>
    %237 = vector.extract_strided_slice %236 {offsets = [0, 0], sizes = [8, 32], strides = [1, 1]} : vector<8x96xf32> to vector<8x32xf32>
    %238 = vector.extract_strided_slice %236 {offsets = [0, 32], sizes = [8, 32], strides = [1, 1]} : vector<8x96xf32> to vector<8x32xf32>
    %239 = vector.extract_strided_slice %236 {offsets = [0, 64], sizes = [8, 32], strides = [1, 1]} : vector<8x96xf32> to vector<8x32xf32>
    %240 = vector.extract_strided_slice %230 {offsets = [0, 96], sizes = [8, 32], strides = [1, 1]} : vector<8x128xf32> to vector<8x32xf32>
    %241 = math.tanh %240 : vector<8x32xf32>
    %242 = arith.mulf %238, %192 : vector<8x32xf32>
    %243 = arith.mulf %237, %241 : vector<8x32xf32>
    %244 = arith.addf %242, %243 : vector<8x32xf32>
    %245 = math.tanh %244 : vector<8x32xf32>
    %246 = arith.mulf %239, %245 : vector<8x32xf32>
    %247 = vector.extract_strided_slice %228 {offsets = [0, 128], sizes = [8, 128], strides = [1, 1]} : vector<8x256xf32> to vector<8x128xf32>
    %248 = arith.addf %226, %247 : vector<8x128xf32>
    %249 = vector.extract_strided_slice %248 {offsets = [0, 0], sizes = [8, 96], strides = [1, 1]} : vector<8x128xf32> to vector<8x96xf32>
    %250 = arith.negf %249 : vector<8x96xf32>
    %251 = math.exp %250 : vector<8x96xf32>
    %cst_54 = arith.constant 1.000000e+00 : f32
    %252 = vector.broadcast %cst_54 : f32 to vector<8x96xf32>
    %253 = arith.addf %252, %251 : vector<8x96xf32>
    %254 = arith.divf %252, %253 : vector<8x96xf32>
    %255 = vector.extract_strided_slice %254 {offsets = [0, 0], sizes = [8, 32], strides = [1, 1]} : vector<8x96xf32> to vector<8x32xf32>
    %256 = vector.extract_strided_slice %254 {offsets = [0, 32], sizes = [8, 32], strides = [1, 1]} : vector<8x96xf32> to vector<8x32xf32>
    %257 = vector.extract_strided_slice %254 {offsets = [0, 64], sizes = [8, 32], strides = [1, 1]} : vector<8x96xf32> to vector<8x32xf32>
    %258 = vector.extract_strided_slice %248 {offsets = [0, 96], sizes = [8, 32], strides = [1, 1]} : vector<8x128xf32> to vector<8x32xf32>
    %259 = math.tanh %258 : vector<8x32xf32>
    %260 = arith.mulf %256, %210 : vector<8x32xf32>
    %261 = arith.mulf %255, %259 : vector<8x32xf32>
    %262 = arith.addf %260, %261 : vector<8x32xf32>
    %263 = math.tanh %262 : vector<8x32xf32>
    %264 = arith.mulf %257, %263 : vector<8x32xf32>
    %265 = arith.index_cast %219 : i32 to index
    %c0_55 = arith.constant 0 : index
    %266 = vector.load %arg15[%265, %c0_55] : memref<64x64xf32, #tpu.memory_space<vmem>>, vector<8x32xf32>
    tpu.vector_store %arg15[%265, %c0_55], %246 {strides = array<i32>} : memref<64x64xf32, #tpu.memory_space<vmem>>, vector<8x32xf32>,
    %267 = arith.index_cast %222 : i32 to index
    %c32_56 = arith.constant 32 : index
    %268 = vector.load %arg15[%267, %c32_56] : memref<64x64xf32, #tpu.memory_space<vmem>>, vector<8x32xf32>
    tpu.vector_store %arg15[%267, %c32_56], %264 {strides = array<i32>} : memref<64x64xf32, #tpu.memory_space<vmem>>, vector<8x32xf32>,
    %269 = tpu.concatenate %246, %264 in 1 : vector<8x32xf32>, vector<8x32xf32> -> vector<8x64xf32>
    %c5_i32 = arith.constant 5 : i32
    %c8_i32_57 = arith.constant 8 : i32
    %270 = arith.muli %c5_i32, %c8_i32_57 : i32
    %271 = tpu.assume_multiple %270, 8 : i32
    %c7_i32_58 = arith.constant 7 : i32
    %272 = arith.subi %c7_i32_58, %c5_i32 : i32
    %c8_i32_59 = arith.constant 8 : i32
    %273 = arith.muli %272, %c8_i32_59 : i32
    %274 = tpu.assume_multiple %273, 8 : i32
    %275 = arith.index_cast %271 : i32 to index
    %c0_60 = arith.constant 0 : index
    %276 = vector.load %arg14[%275, %c0_60] : memref<64x256xf32, #tpu.memory_space<vmem>>, vector<8x128xf32>
    %277 = arith.index_cast %274 : i32 to index
    %c128_61 = arith.constant 128 : index
    %278 = vector.load %arg14[%277, %c128_61] : memref<64x256xf32, #tpu.memory_space<vmem>>, vector<8x128xf32>
    %279 = arith.truncf %269 : vector<8x64xf32> to vector<8x64xbf16>
    %cst_62 = arith.constant dense<0.000000e+00> : vector<8x256xf32>
    %280 = tpu.matmul %279, %7, %cst_62 {dimension_numbers = #tpu.dot_dimension_numbers<[1], [0], [0], [1], [0, 0, 1, 1], [], []>} : vector<8x64xbf16>, vector<64x256xbf16>, vector<8x256xf32> -> vector<8x256xf32>
    %281 = vector.extract_strided_slice %280 {offsets = [0, 0], sizes = [8, 128], strides = [1, 1]} : vector<8x256xf32> to vector<8x128xf32>
    %282 = arith.addf %276, %281 : vector<8x128xf32>
    %283 = vector.extract_strided_slice %282 {offsets = [0, 0], sizes = [8, 96], strides = [1, 1]} : vector<8x128xf32> to vector<8x96xf32>
    %284 = arith.negf %283 : vector<8x96xf32>
    %285 = math.exp %284 : vector<8x96xf32>
    %cst_63 = arith.constant 1.000000e+00 : f32
    %286 = vector.broadcast %cst_63 : f32 to vector<8x96xf32>
    %287 = arith.addf %286, %285 : vector<8x96xf32>
    %288 = arith.divf %286, %287 : vector<8x96xf32>
    %289 = vector.extract_strided_slice %288 {offsets = [0, 0], sizes = [8, 32], strides = [1, 1]} : vector<8x96xf32> to vector<8x32xf32>
    %290 = vector.extract_strided_slice %288 {offsets = [0, 32], sizes = [8, 32], strides = [1, 1]} : vector<8x96xf32> to vector<8x32xf32>
    %291 = vector.extract_strided_slice %288 {offsets = [0, 64], sizes = [8, 32], strides = [1, 1]} : vector<8x96xf32> to vector<8x32xf32>
    %292 = vector.extract_strided_slice %282 {offsets = [0, 96], sizes = [8, 32], strides = [1, 1]} : vector<8x128xf32> to vector<8x32xf32>
    %293 = math.tanh %292 : vector<8x32xf32>
    %294 = arith.mulf %290, %244 : vector<8x32xf32>
    %295 = arith.mulf %289, %293 : vector<8x32xf32>
    %296 = arith.addf %294, %295 : vector<8x32xf32>
    %297 = math.tanh %296 : vector<8x32xf32>
    %298 = arith.mulf %291, %297 : vector<8x32xf32>
    %299 = vector.extract_strided_slice %280 {offsets = [0, 128], sizes = [8, 128], strides = [1, 1]} : vector<8x256xf32> to vector<8x128xf32>
    %300 = arith.addf %278, %299 : vector<8x128xf32>
    %301 = vector.extract_strided_slice %300 {offsets = [0, 0], sizes = [8, 96], strides = [1, 1]} : vector<8x128xf32> to vector<8x96xf32>
    %302 = arith.negf %301 : vector<8x96xf32>
    %303 = math.exp %302 : vector<8x96xf32>
    %cst_64 = arith.constant 1.000000e+00 : f32
    %304 = vector.broadcast %cst_64 : f32 to vector<8x96xf32>
    %305 = arith.addf %304, %303 : vector<8x96xf32>
    %306 = arith.divf %304, %305 : vector<8x96xf32>
    %307 = vector.extract_strided_slice %306 {offsets = [0, 0], sizes = [8, 32], strides = [1, 1]} : vector<8x96xf32> to vector<8x32xf32>
    %308 = vector.extract_strided_slice %306 {offsets = [0, 32], sizes = [8, 32], strides = [1, 1]} : vector<8x96xf32> to vector<8x32xf32>
    %309 = vector.extract_strided_slice %306 {offsets = [0, 64], sizes = [8, 32], strides = [1, 1]} : vector<8x96xf32> to vector<8x32xf32>
    %310 = vector.extract_strided_slice %300 {offsets = [0, 96], sizes = [8, 32], strides = [1, 1]} : vector<8x128xf32> to vector<8x32xf32>
    %311 = math.tanh %310 : vector<8x32xf32>
    %312 = arith.mulf %308, %262 : vector<8x32xf32>
    %313 = arith.mulf %307, %311 : vector<8x32xf32>
    %314 = arith.addf %312, %313 : vector<8x32xf32>
    %315 = math.tanh %314 : vector<8x32xf32>
    %316 = arith.mulf %309, %315 : vector<8x32xf32>
    %317 = arith.index_cast %271 : i32 to index
    %c0_65 = arith.constant 0 : index
    %318 = vector.load %arg15[%317, %c0_65] : memref<64x64xf32, #tpu.memory_space<vmem>>, vector<8x32xf32>
    tpu.vector_store %arg15[%317, %c0_65], %298 {strides = array<i32>} : memref<64x64xf32, #tpu.memory_space<vmem>>, vector<8x32xf32>,
    %319 = arith.index_cast %274 : i32 to index
    %c32_66 = arith.constant 32 : index
    %320 = vector.load %arg15[%319, %c32_66] : memref<64x64xf32, #tpu.memory_space<vmem>>, vector<8x32xf32>
    tpu.vector_store %arg15[%319, %c32_66], %316 {strides = array<i32>} : memref<64x64xf32, #tpu.memory_space<vmem>>, vector<8x32xf32>,
    %321 = tpu.concatenate %298, %316 in 1 : vector<8x32xf32>, vector<8x32xf32> -> vector<8x64xf32>
    %c6_i32 = arith.constant 6 : i32
    %c8_i32_67 = arith.constant 8 : i32
    %322 = arith.muli %c6_i32, %c8_i32_67 : i32
    %323 = tpu.assume_multiple %322, 8 : i32
    %c7_i32_68 = arith.constant 7 : i32
    %324 = arith.subi %c7_i32_68, %c6_i32 : i32
    %c8_i32_69 = arith.constant 8 : i32
    %325 = arith.muli %324, %c8_i32_69 : i32
    %326 = tpu.assume_multiple %325, 8 : i32
    %327 = arith.index_cast %323 : i32 to index
    %c0_70 = arith.constant 0 : index
    %328 = vector.load %arg14[%327, %c0_70] : memref<64x256xf32, #tpu.memory_space<vmem>>, vector<8x128xf32>
    %329 = arith.index_cast %326 : i32 to index
    %c128_71 = arith.constant 128 : index
    %330 = vector.load %arg14[%329, %c128_71] : memref<64x256xf32, #tpu.memory_space<vmem>>, vector<8x128xf32>
    %331 = arith.truncf %321 : vector<8x64xf32> to vector<8x64xbf16>
    %cst_72 = arith.constant dense<0.000000e+00> : vector<8x256xf32>
    %332 = tpu.matmul %331, %7, %cst_72 {dimension_numbers = #tpu.dot_dimension_numbers<[1], [0], [0], [1], [0, 0, 1, 1], [], []>} : vector<8x64xbf16>, vector<64x256xbf16>, vector<8x256xf32> -> vector<8x256xf32>
    %333 = vector.extract_strided_slice %332 {offsets = [0, 0], sizes = [8, 128], strides = [1, 1]} : vector<8x256xf32> to vector<8x128xf32>
    %334 = arith.addf %328, %333 : vector<8x128xf32>
    %335 = vector.extract_strided_slice %334 {offsets = [0, 0], sizes = [8, 96], strides = [1, 1]} : vector<8x128xf32> to vector<8x96xf32>
    %336 = arith.negf %335 : vector<8x96xf32>
    %337 = math.exp %336 : vector<8x96xf32>
    %cst_73 = arith.constant 1.000000e+00 : f32
    %338 = vector.broadcast %cst_73 : f32 to vector<8x96xf32>
    %339 = arith.addf %338, %337 : vector<8x96xf32>
    %340 = arith.divf %338, %339 : vector<8x96xf32>
    %341 = vector.extract_strided_slice %340 {offsets = [0, 0], sizes = [8, 32], strides = [1, 1]} : vector<8x96xf32> to vector<8x32xf32>
    %342 = vector.extract_strided_slice %340 {offsets = [0, 32], sizes = [8, 32], strides = [1, 1]} : vector<8x96xf32> to vector<8x32xf32>
    %343 = vector.extract_strided_slice %340 {offsets = [0, 64], sizes = [8, 32], strides = [1, 1]} : vector<8x96xf32> to vector<8x32xf32>
    %344 = vector.extract_strided_slice %334 {offsets = [0, 96], sizes = [8, 32], strides = [1, 1]} : vector<8x128xf32> to vector<8x32xf32>
    %345 = math.tanh %344 : vector<8x32xf32>
    %346 = arith.mulf %342, %296 : vector<8x32xf32>
    %347 = arith.mulf %341, %345 : vector<8x32xf32>
    %348 = arith.addf %346, %347 : vector<8x32xf32>
    %349 = math.tanh %348 : vector<8x32xf32>
    %350 = arith.mulf %343, %349 : vector<8x32xf32>
    %351 = vector.extract_strided_slice %332 {offsets = [0, 128], sizes = [8, 128], strides = [1, 1]} : vector<8x256xf32> to vector<8x128xf32>
    %352 = arith.addf %330, %351 : vector<8x128xf32>
    %353 = vector.extract_strided_slice %352 {offsets = [0, 0], sizes = [8, 96], strides = [1, 1]} : vector<8x128xf32> to vector<8x96xf32>
    %354 = arith.negf %353 : vector<8x96xf32>
    %355 = math.exp %354 : vector<8x96xf32>
    %cst_74 = arith.constant 1.000000e+00 : f32
    %356 = vector.broadcast %cst_74 : f32 to vector<8x96xf32>
    %357 = arith.addf %356, %355 : vector<8x96xf32>
    %358 = arith.divf %356, %357 : vector<8x96xf32>
    %359 = vector.extract_strided_slice %358 {offsets = [0, 0], sizes = [8, 32], strides = [1, 1]} : vector<8x96xf32> to vector<8x32xf32>
    %360 = vector.extract_strided_slice %358 {offsets = [0, 32], sizes = [8, 32], strides = [1, 1]} : vector<8x96xf32> to vector<8x32xf32>
    %361 = vector.extract_strided_slice %358 {offsets = [0, 64], sizes = [8, 32], strides = [1, 1]} : vector<8x96xf32> to vector<8x32xf32>
    %362 = vector.extract_strided_slice %352 {offsets = [0, 96], sizes = [8, 32], strides = [1, 1]} : vector<8x128xf32> to vector<8x32xf32>
    %363 = math.tanh %362 : vector<8x32xf32>
    %364 = arith.mulf %360, %314 : vector<8x32xf32>
    %365 = arith.mulf %359, %363 : vector<8x32xf32>
    %366 = arith.addf %364, %365 : vector<8x32xf32>
    %367 = math.tanh %366 : vector<8x32xf32>
    %368 = arith.mulf %361, %367 : vector<8x32xf32>
    %369 = arith.index_cast %323 : i32 to index
    %c0_75 = arith.constant 0 : index
    %370 = vector.load %arg15[%369, %c0_75] : memref<64x64xf32, #tpu.memory_space<vmem>>, vector<8x32xf32>
    tpu.vector_store %arg15[%369, %c0_75], %350 {strides = array<i32>} : memref<64x64xf32, #tpu.memory_space<vmem>>, vector<8x32xf32>,
    %371 = arith.index_cast %326 : i32 to index
    %c32_76 = arith.constant 32 : index
    %372 = vector.load %arg15[%371, %c32_76] : memref<64x64xf32, #tpu.memory_space<vmem>>, vector<8x32xf32>
    tpu.vector_store %arg15[%371, %c32_76], %368 {strides = array<i32>} : memref<64x64xf32, #tpu.memory_space<vmem>>, vector<8x32xf32>,
    %373 = tpu.concatenate %350, %368 in 1 : vector<8x32xf32>, vector<8x32xf32> -> vector<8x64xf32>
    %c7_i32_77 = arith.constant 7 : i32
    %c8_i32_78 = arith.constant 8 : i32
    %374 = arith.muli %c7_i32_77, %c8_i32_78 : i32
    %375 = tpu.assume_multiple %374, 8 : i32
    %c7_i32_79 = arith.constant 7 : i32
    %376 = arith.subi %c7_i32_79, %c7_i32_77 : i32
    %c8_i32_80 = arith.constant 8 : i32
    %377 = arith.muli %376, %c8_i32_80 : i32
    %378 = tpu.assume_multiple %377, 8 : i32
    %379 = arith.index_cast %375 : i32 to index
    %c0_81 = arith.constant 0 : index
    %380 = vector.load %arg14[%379, %c0_81] : memref<64x256xf32, #tpu.memory_space<vmem>>, vector<8x128xf32>
    %381 = arith.index_cast %378 : i32 to index
    %c128_82 = arith.constant 128 : index
    %382 = vector.load %arg14[%381, %c128_82] : memref<64x256xf32, #tpu.memory_space<vmem>>, vector<8x128xf32>
    %383 = arith.truncf %373 : vector<8x64xf32> to vector<8x64xbf16>
    %cst_83 = arith.constant dense<0.000000e+00> : vector<8x256xf32>
    %384 = tpu.matmul %383, %7, %cst_83 {dimension_numbers = #tpu.dot_dimension_numbers<[1], [0], [0], [1], [0, 0, 1, 1], [], []>} : vector<8x64xbf16>, vector<64x256xbf16>, vector<8x256xf32> -> vector<8x256xf32>
    %385 = vector.extract_strided_slice %384 {offsets = [0, 0], sizes = [8, 128], strides = [1, 1]} : vector<8x256xf32> to vector<8x128xf32>
    %386 = arith.addf %380, %385 : vector<8x128xf32>
    %387 = vector.extract_strided_slice %386 {offsets = [0, 0], sizes = [8, 96], strides = [1, 1]} : vector<8x128xf32> to vector<8x96xf32>
    %388 = arith.negf %387 : vector<8x96xf32>
    %389 = math.exp %388 : vector<8x96xf32>
    %cst_84 = arith.constant 1.000000e+00 : f32
    %390 = vector.broadcast %cst_84 : f32 to vector<8x96xf32>
    %391 = arith.addf %390, %389 : vector<8x96xf32>
    %392 = arith.divf %390, %391 : vector<8x96xf32>
    %393 = vector.extract_strided_slice %392 {offsets = [0, 0], sizes = [8, 32], strides = [1, 1]} : vector<8x96xf32> to vector<8x32xf32>
    %394 = vector.extract_strided_slice %392 {offsets = [0, 32], sizes = [8, 32], strides = [1, 1]} : vector<8x96xf32> to vector<8x32xf32>
    %395 = vector.extract_strided_slice %392 {offsets = [0, 64], sizes = [8, 32], strides = [1, 1]} : vector<8x96xf32> to vector<8x32xf32>
    %396 = vector.extract_strided_slice %386 {offsets = [0, 96], sizes = [8, 32], strides = [1, 1]} : vector<8x128xf32> to vector<8x32xf32>
    %397 = math.tanh %396 : vector<8x32xf32>
    %398 = arith.mulf %394, %348 : vector<8x32xf32>
    %399 = arith.mulf %393, %397 : vector<8x32xf32>
    %400 = arith.addf %398, %399 : vector<8x32xf32>
    %401 = math.tanh %400 : vector<8x32xf32>
    %402 = arith.mulf %395, %401 : vector<8x32xf32>
    %403 = vector.extract_strided_slice %384 {offsets = [0, 128], sizes = [8, 128], strides = [1, 1]} : vector<8x256xf32> to vector<8x128xf32>
    %404 = arith.addf %382, %403 : vector<8x128xf32>
    %405 = vector.extract_strided_slice %404 {offsets = [0, 0], sizes = [8, 96], strides = [1, 1]} : vector<8x128xf32> to vector<8x96xf32>
    %406 = arith.negf %405 : vector<8x96xf32>
    %407 = math.exp %406 : vector<8x96xf32>
    %cst_85 = arith.constant 1.000000e+00 : f32
    %408 = vector.broadcast %cst_85 : f32 to vector<8x96xf32>
    %409 = arith.addf %408, %407 : vector<8x96xf32>
    %410 = arith.divf %408, %409 : vector<8x96xf32>
    %411 = vector.extract_strided_slice %410 {offsets = [0, 0], sizes = [8, 32], strides = [1, 1]} : vector<8x96xf32> to vector<8x32xf32>
    %412 = vector.extract_strided_slice %410 {offsets = [0, 32], sizes = [8, 32], strides = [1, 1]} : vector<8x96xf32> to vector<8x32xf32>
    %413 = vector.extract_strided_slice %410 {offsets = [0, 64], sizes = [8, 32], strides = [1, 1]} : vector<8x96xf32> to vector<8x32xf32>
    %414 = vector.extract_strided_slice %404 {offsets = [0, 96], sizes = [8, 32], strides = [1, 1]} : vector<8x128xf32> to vector<8x32xf32>
    %415 = math.tanh %414 : vector<8x32xf32>
    %416 = arith.mulf %412, %366 : vector<8x32xf32>
    %417 = arith.mulf %411, %415 : vector<8x32xf32>
    %418 = arith.addf %416, %417 : vector<8x32xf32>
    %419 = math.tanh %418 : vector<8x32xf32>
    %420 = arith.mulf %413, %419 : vector<8x32xf32>
    %421 = arith.index_cast %375 : i32 to index
    %c0_86 = arith.constant 0 : index
    %422 = vector.load %arg15[%421, %c0_86] : memref<64x64xf32, #tpu.memory_space<vmem>>, vector<8x32xf32>
    tpu.vector_store %arg15[%421, %c0_86], %402 {strides = array<i32>} : memref<64x64xf32, #tpu.memory_space<vmem>>, vector<8x32xf32>,
    %423 = arith.index_cast %378 : i32 to index
    %c32_87 = arith.constant 32 : index
    %424 = vector.load %arg15[%423, %c32_87] : memref<64x64xf32, #tpu.memory_space<vmem>>, vector<8x32xf32>
    tpu.vector_store %arg15[%423, %c32_87], %420 {strides = array<i32>} : memref<64x64xf32, #tpu.memory_space<vmem>>, vector<8x32xf32>,
    %425 = tpu.concatenate %402, %420 in 1 : vector<8x32xf32>, vector<8x32xf32> -> vector<8x64xf32>
    %c8_i32_88 = arith.constant 8 : i32
    %c0_89 = arith.constant 0 : index
    %c0_90 = arith.constant 0 : index
    %426 = vector.load %arg1[%c0_89, %c0_90] : memref<64x1xf32, #tpu.memory_space<vmem>>, vector<64x1xf32>
    %c0_91 = arith.constant 0 : index
    %c0_92 = arith.constant 0 : index
    %427 = vector.load %arg15[%c0_91, %c0_92] : memref<64x64xf32, #tpu.memory_space<vmem>>, vector<64x64xf32>
    %428 = vector.broadcast %426 : vector<64x1xf32> to vector<64x64xf32>
    %429 = arith.mulf %427, %428 : vector<64x64xf32>
    %430 = math.tanh %429 : vector<64x64xf32>
    %c0_93 = arith.constant 0 : index
    %c0_94 = arith.constant 0 : index
    %431 = vector.load %arg5[%c0_93, %c0_94] : memref<1x64xf32, #tpu.memory_space<vmem>>, vector<1x64xf32>
    %432 = vector.broadcast %431 : vector<1x64xf32> to vector<64x64xf32>
    %433 = arith.mulf %430, %432 : vector<64x64xf32>
    %cst_95 = arith.constant dense<0.000000e+00> : vector<64xf32>
    %434 = vector.multi_reduction <add>, %433, %cst_95 [1] : vector<64x64xf32> to vector<64xf32>
    %435 = vector.shape_cast %434 : vector<64xf32> to vector<64x1xf32>
    %c0_96 = arith.constant 0 : index
    %c0_97 = arith.constant 0 : index
    %436 = vector.load %arg6[%c0_96, %c0_97] : memref<1x1xf32, #tpu.memory_space<vmem>>, vector<1x1xf32>
    %437 = vector.broadcast %436 : vector<1x1xf32> to vector<64x1xf32>
    %438 = arith.addf %435, %437 : vector<64x1xf32>
    %439 = vector.shape_cast %438 : vector<64x1xf32> to vector<1x64x1xf32>
    %cst_98 = arith.constant dense<0xFF800000> : vector<1xf32>
    %440 = vector.multi_reduction <maximumf>, %439, %cst_98 [1, 2] : vector<1x64x1xf32> to vector<1xf32>
    %441 = vector.shape_cast %440 : vector<1xf32> to vector<1x1x1xf32>
    %442 = vector.extract %441[0, 0, 0] : f32 from vector<1x1x1xf32>
    %443 = vector.broadcast %442 : f32 to vector<1x1xf32>
    %444 = vector.broadcast %443 : vector<1x1xf32> to vector<64x1xf32>
    %445 = arith.subf %438, %444 : vector<64x1xf32>
    %446 = math.exp %445 : vector<64x1xf32>
    %447 = vector.broadcast %446 : vector<64x1xf32> to vector<64x64xf32>
    %448 = arith.mulf %429, %447 : vector<64x64xf32>
    %449 = vector.extract_strided_slice %446 {offsets = [0, 0], sizes = [8, 1], strides = [1, 1]} : vector<64x1xf32> to vector<8x1xf32>
    %450 = vector.extract_strided_slice %448 {offsets = [0, 0], sizes = [8, 64], strides = [1, 1]} : vector<64x64xf32> to vector<8x64xf32>
    %451 = vector.extract_strided_slice %446 {offsets = [8, 0], sizes = [8, 1], strides = [1, 1]} : vector<64x1xf32> to vector<8x1xf32>
    %452 = arith.addf %449, %451 : vector<8x1xf32>
    %453 = vector.extract_strided_slice %448 {offsets = [8, 0], sizes = [8, 64], strides = [1, 1]} : vector<64x64xf32> to vector<8x64xf32>
    %454 = arith.addf %450, %453 : vector<8x64xf32>
    %455 = vector.extract_strided_slice %446 {offsets = [16, 0], sizes = [8, 1], strides = [1, 1]} : vector<64x1xf32> to vector<8x1xf32>
    %456 = arith.addf %452, %455 : vector<8x1xf32>
    %457 = vector.extract_strided_slice %448 {offsets = [16, 0], sizes = [8, 64], strides = [1, 1]} : vector<64x64xf32> to vector<8x64xf32>
    %458 = arith.addf %454, %457 : vector<8x64xf32>
    %459 = vector.extract_strided_slice %446 {offsets = [24, 0], sizes = [8, 1], strides = [1, 1]} : vector<64x1xf32> to vector<8x1xf32>
    %460 = arith.addf %456, %459 : vector<8x1xf32>
    %461 = vector.extract_strided_slice %448 {offsets = [24, 0], sizes = [8, 64], strides = [1, 1]} : vector<64x64xf32> to vector<8x64xf32>
    %462 = arith.addf %458, %461 : vector<8x64xf32>
    %463 = vector.extract_strided_slice %446 {offsets = [32, 0], sizes = [8, 1], strides = [1, 1]} : vector<64x1xf32> to vector<8x1xf32>
    %464 = arith.addf %460, %463 : vector<8x1xf32>
    %465 = vector.extract_strided_slice %448 {offsets = [32, 0], sizes = [8, 64], strides = [1, 1]} : vector<64x64xf32> to vector<8x64xf32>
    %466 = arith.addf %462, %465 : vector<8x64xf32>
    %467 = vector.extract_strided_slice %446 {offsets = [40, 0], sizes = [8, 1], strides = [1, 1]} : vector<64x1xf32> to vector<8x1xf32>
    %468 = arith.addf %464, %467 : vector<8x1xf32>
    %469 = vector.extract_strided_slice %448 {offsets = [40, 0], sizes = [8, 64], strides = [1, 1]} : vector<64x64xf32> to vector<8x64xf32>
    %470 = arith.addf %466, %469 : vector<8x64xf32>
    %471 = vector.extract_strided_slice %446 {offsets = [48, 0], sizes = [8, 1], strides = [1, 1]} : vector<64x1xf32> to vector<8x1xf32>
    %472 = arith.addf %468, %471 : vector<8x1xf32>
    %473 = vector.extract_strided_slice %448 {offsets = [48, 0], sizes = [8, 64], strides = [1, 1]} : vector<64x64xf32> to vector<8x64xf32>
    %474 = arith.addf %470, %473 : vector<8x64xf32>
    %475 = vector.extract_strided_slice %446 {offsets = [56, 0], sizes = [8, 1], strides = [1, 1]} : vector<64x1xf32> to vector<8x1xf32>
    %476 = arith.addf %472, %475 : vector<8x1xf32>
    %477 = vector.extract_strided_slice %448 {offsets = [56, 0], sizes = [8, 64], strides = [1, 1]} : vector<64x64xf32> to vector<8x64xf32>
    %478 = arith.addf %474, %477 : vector<8x64xf32>
    %479 = tpu.reciprocal %476 {approx = true} : vector<8x1xf32> -> vector<8x1xf32>
    %480 = vector.broadcast %479 : vector<8x1xf32> to vector<8x64xf32>
    %481 = arith.mulf %478, %480 : vector<8x64xf32>
    %482 = math.tanh %481 : vector<8x64xf32>
    %483 = arith.truncf %482 : vector<8x64xf32> to vector<8x64xbf16>
    %c0_99 = arith.constant 0 : index
    %c0_100 = arith.constant 0 : index
    %484 = vector.load %arg7[%c0_99, %c0_100] : memref<64x64xbf16, #tpu.memory_space<vmem>>, vector<64x64xbf16>
    %cst_101 = arith.constant dense<0.000000e+00> : vector<8x64xf32>
    %485 = tpu.matmul %483, %484, %cst_101 {dimension_numbers = #tpu.dot_dimension_numbers<[1], [0], [0], [1], [0, 0, 1, 1], [], []>} : vector<8x64xbf16>, vector<64x64xbf16>, vector<8x64xf32> -> vector<8x64xf32>
    %c0_102 = arith.constant 0 : index
    %c0_103 = arith.constant 0 : index
    %486 = vector.load %arg8[%c0_102, %c0_103] : memref<1x64xf32, #tpu.memory_space<vmem>>, vector<1x64xf32>
    %487 = vector.broadcast %486 : vector<1x64xf32> to vector<8x64xf32>
    %488 = arith.addf %485, %487 : vector<8x64xf32>
    %c0_104 = arith.constant 0 : index
    %c0_105 = arith.constant 0 : index
    %489 = vector.load %arg9[%c0_104, %c0_105] : memref<1x64xf32, #tpu.memory_space<vmem>>, vector<1x64xf32>
    %490 = vector.broadcast %489 : vector<1x64xf32> to vector<8x64xf32>
    %491 = arith.mulf %488, %490 : vector<8x64xf32>
    %c0_106 = arith.constant 0 : index
    %c0_107 = arith.constant 0 : index
    %492 = vector.load %arg10[%c0_106, %c0_107] : memref<1x64xf32, #tpu.memory_space<vmem>>, vector<1x64xf32>
    %493 = vector.broadcast %492 : vector<1x64xf32> to vector<8x64xf32>
    %494 = arith.addf %491, %493 : vector<8x64xf32>
    %495 = math.tanh %494 : vector<8x64xf32>
    %496 = arith.truncf %495 : vector<8x64xf32> to vector<8x64xbf16>
    %c0_108 = arith.constant 0 : index
    %c0_109 = arith.constant 0 : index
    %497 = vector.load %arg11[%c0_108, %c0_109] : memref<64x128xbf16, #tpu.memory_space<vmem>>, vector<64x128xbf16>
    %cst_110 = arith.constant dense<0.000000e+00> : vector<8x128xf32>
    %498 = tpu.matmul %496, %497, %cst_110 {dimension_numbers = #tpu.dot_dimension_numbers<[1], [0], [0], [1], [0, 0, 1, 1], [], []>} : vector<8x64xbf16>, vector<64x128xbf16>, vector<8x128xf32> -> vector<8x128xf32>
    %c0_111 = arith.constant 0 : index
    %c0_112 = arith.constant 0 : index
    %499 = vector.load %arg12[%c0_111, %c0_112] : memref<1x128xf32, #tpu.memory_space<vmem>>, vector<1x128xf32>
    %500 = vector.broadcast %499 : vector<1x128xf32> to vector<8x128xf32>
    %501 = arith.addf %498, %500 : vector<8x128xf32>
    %c0_113 = arith.constant 0 : index
    %c0_114 = arith.constant 0 : index
    %502 = vector.load %arg13[%c0_113, %c0_114] : memref<8x128xf32, #tpu.memory_space<vmem>>, vector<8x128xf32>
    tpu.vector_store %arg13[%c0_113, %c0_114], %501 {strides = array<i32>} : memref<8x128xf32, #tpu.memory_space<vmem>>, vector<8x128xf32>,
    return
  }
}

</mosaic_0001>

<bundles_post_ra>
// kernel: relation_prediction_forward.1
= control target key start
LH: loop header
LB: loop body
LE: loop exit
PB: predicated region body
PF: predicated region fallthrough
CT: control target
= control target key end

     0   :  { %v1896_v1 = vmov 0   ;;  %vm111_vm0 = vcmask 261120   ;;  %v61_v17 = vlaneseq  ;;  %s1899_s23 = smov 96   ;;  %vm374_vm1 = vcmask 523520   ;;  %s2385_s2 = inlined_call_operand.vmem [shape: bf16[32,256], index: 2, kind: input, shape index: {}]   ;;  %s2386_s3 = inlined_call_operand.vmem [shape: bf16[64,256], index: 3, kind: input, shape index: {}]   ;;  %s2387_s0 = inlined_call_operand.vmem [shape: bf16[64,32], index: 0, kind: input, shape index: {}]   ;;  %s2388_s4 = inlined_call_operand.vmem [shape: f32[1,256], index: 4, kind: input, shape index: {}]   ;;  %s2389_s1 = inlined_call_operand.vmem [shape: f32[64,1], index: 1, kind: input, shape index: {}]   ;;  %s2390_s6 = inlined_call_operand.<no memory space> [shape: f32[1,1], index: 6, kind: input, shape index: {}]   ;;  %s2391_s5 = inlined_call_operand.vmem [shape: f32[1,64], index: 5, kind: input, shape index: {}]   ;;  %s2392_s7 = inlined_call_operand.vmem [shape: bf16[64,64], index: 7, kind: input, shape index: {}]   ;;  %s2393_s11 = inlined_call_operand.vmem [shape: bf16[64,128], index: 11, kind: input, shape index: {}]   ;;  %s2394_s8 = inlined_call_operand.vmem [shape: f32[1,64], index: 8, kind: input, shape index: {}]   ;;  %s2395_s9 = inlined_call_operand.vmem [shape: f32[1,64], index: 9, kind: input, shape index: {}]   ;;  %s2396_s10 = inlined_call_operand.vmem [shape: f32[1,64], index: 10, kind: input, shape index: {}]   ;;  %s2397_s12 = inlined_call_operand.vmem [shape: f32[1,128], index: 12, kind: input, shape index: {}]   ;;  %s2398_s13 = inlined_call_operand.vmem [shape: f32[8,128], index: 13, kind: output, shape index: {}]  }
   0x1   :  { %v1700_v0 = vld [vmem:[%s2385_s2 + $0x14] ss:$8 sps:$4 sm:$0xff]   ;;  %156 = vmatprep.mubr.bf16.mxu0 %v1896_v1  ;;  %305 = vmatprep.mubr.bf16.mxu1 %v1896_v1  ;;  %v1704_v3 = vld [vmem:[%s2385_s2 + $0x10] ss:$8 sps:$4 sm:$0xff]   ;;  %v1706_v5 = vld [vmem:[%s2385_s2 + $0x4] ss:$8 sps:$4 sm:$0xff]  }
   0x2   :  { %v1980_v2 = vld [vmem:[%s2386_s3 + $0x34] ss:$8 sps:$4 sm:$0xff]   ;;  %1698 = vset.pattern.permute.xlu0 %v1896_v1  ;;  %1699 = vset.pattern.permute.xlu1 %v1896_v1  ;;  %v1990_v4 = vld [vmem:[%s2386_s3 + $0x30] ss:$8 sps:$4 sm:$0xff]   ;;  %v2000_v6 = vld [vmem:[%s2386_s3 + $0x24] ss:$8 sps:$4 sm:$0xff]  }
   0x3   :  { %136 = vmatprep.subr.bf16.mxu0 %v1700_v0  ;;  %281 = vmatprep.subr.bf16.mxu1 %v1980_v2  ;;  %v1710_v7 = vld [vmem:[%s2385_s2] ss:$8 sps:$4 sm:$0xff]   ;;  %v2017_v10 = vld [vmem:[%s2386_s3 + $0x14] ss:$8 sps:$4 sm:$0xff]   ;;  %v2023_v11 = vld [vmem:[%s2386_s3 + $0x10] ss:$8 sps:$4 sm:$0xff]  }
   0x4   :  { %137 = vmatpush1.bf16.msra.mxu0 %v1704_v3  ;;  %282 = vmatpush1.bf16.msra.mxu1 %v1990_v4  ;;  %v2008_v8 = vld [vmem:[%s2386_s3 + $0x20] ss:$8 sps:$4 sm:$0xff]   ;;  %v2029_v12 = vld [vmem:[%s2386_s3 + $0x4] ss:$8 sps:$4 sm:$0xff]   ;;  %v1720_v15 = vld [vmem:[%s2387_s0 + $0x10] sm:$0xff]   ;;  %v62_v18 = vshrl.u32 %v61_v17, 7 }
   0x5   :  { %138 = vmatprep.subr.bf16.mxu0 %v1706_v5  ;;  %283 = vmatprep.subr.bf16.mxu1 %v2000_v6  ;;  %v1712_v9 = vld [vmem:[%s2387_s0] sm:$0xff]   ;;  %v1719_v14 = vld [vmem:[%s2387_s0 + $0x8] sm:$0xff]   ;;  %v1721_v16 = vld [vmem:[%s2387_s0 + $0x18] sm:$0xff]   ;;  %s1897_s0 = smov 32   ;;  %vm269_vm2 = vcmask 523264   ;;  %vm1282_vm3 = vcmask 7168  }
   0x6   :  { %v2037_v13 = vld [vmem:[%s2386_s3] ss:$8 sps:$4 sm:$0xff]   ;;  %v67_v19 = vsub.s32 1, %v62_v18  ;;  %v63_v21 = vsub.s32 0, %v62_v18  ;;  %vm1901_vm4 = vmmov 0  }
   0x7   :  { %v59_v20 = vld [vmem:[%s2388_s4] sm:$0x3]  ;;  %s1898_s4 = smov 64  }
   0x8   :  { %139 = vmatpush1.bf16.msra.mxu0 %v1710_v7  ;;  %284 = vmatpush1.bf16.msra.mxu1 %v2008_v8  ;;  %v68_v22 = vrot.slane %v59_v20, %v67_v19  ;;  %v64_v25 = vrot.slane %v59_v20, %v63_v21 }
   0x9   :  { %285 = vmatprep.subr.bf16.mxu1 %v2017_v10  ;;  %513 = vmatprep.subr.bf16.mxu0 %v1980_v2 }
   0xb   :  { %1605 = vmatmul.mubr.msk.bf16.vlgmr.msra.gmra.mxu0 %vm111_vm0, %v1712_v9 }
   0xc   :  { %286 = vmatpush1.bf16.msra.mxu1 %v2023_v11  ;;  %166 = vmatprep.mubr.bf16.mxu0 %v1896_v1 }
   0xd   :  { %287 = vmatprep.subr.bf16.mxu1 %v2029_v12  ;;  %514 = vmatpush1.bf16.msra.mxu0 %v1990_v4 }
   0xe   :  { %515 = vmatprep.subr.bf16.mxu0 %v2000_v6 }
  0x10   :  { %288 = vmatpush1.bf16.msra.mxu1 %v2037_v13 }
  0x11   :  { %397 = vmatprep.subr.bf16.mxu1 %v1980_v2  ;;  %516 = vmatpush1.bf16.msra.mxu0 %v2008_v8 }
  0x12   :  { %517 = vmatprep.subr.bf16.mxu0 %v2017_v10 }
  0x13   :  { %1606 = vmatmul.mubr.msk.bf16.gmra.mxu0 %vm111_vm0, %v1719_v14  ;;  %306 = vmatmul.mubr.bf16.vlgmr.msra.gmra.mxu1 %v1896_v1 }
  0x14   :  { %176 = vmatprep.mubr.bf16.mxu0 %v1896_v1  ;;  %398 = vmatpush1.bf16.msra.mxu1 %v1990_v4 }
  0x15   :  { %399 = vmatprep.subr.bf16.mxu1 %v2000_v6  ;;  %421 = vmatprep.mubr.bf16.mxu1 %v1896_v1 }
  0x16   :  { %518 = vmatpush1.bf16.msra.mxu0 %v2023_v11 }
  0x17   :  { %519 = vmatprep.subr.bf16.mxu0 %v2029_v12 }
  0x18   :  { %400 = vmatpush1.bf16.msra.mxu1 %v2008_v8 }
  0x19   :  { %401 = vmatprep.subr.bf16.mxu1 %v2017_v10 }
  0x1a   :  { %520 = vmatpush1.bf16.msra.mxu0 %v2037_v13 }
  0x1b   :  { %1607 = vmatmul.mubr.msk.bf16.gmra.mxu0 %vm111_vm0, %v1720_v15  ;;  %739 = vmatprep.subr.bf16.mxu0 %v1980_v2 }
  0x1c   :  { %186 = vmatprep.mubr.bf16.mxu0 %v1896_v1  ;;  %402 = vmatpush1.bf16.msra.mxu1 %v2023_v11 }
  0x1d   :  { %403 = vmatprep.subr.bf16.mxu1 %v2029_v12 }
  0x20   :  { %404 = vmatpush1.bf16.msra.mxu1 %v2037_v13 }
  0x21   :  { %629 = vmatprep.subr.bf16.mxu1 %v1980_v2 }
  0x23   :  { %1608 = vmatmul.mubr.msk.bf16.gmra.mxu0 %vm111_vm0, %v1721_v16 }
  0x24   :  { %537 = vmatprep.mubr.bf16.mxu0 %v1896_v1 }
  0xcb   :  { %v158_v23 = vpop.f32.mrf.mxu0 }
  0xcc   :  { %v159_v30 = vadd.f32 %v158_v23, %v64_v25 }
  0xcd   :  { %v160_v24 = vpop.f32.mrf.mxu0 }
  0xce   :  { %v2079_v26 = vadd.f32 %v160_v24, %v68_v22 }
  0xcf   :  { %v162_v27 = vpop.f32.mrf.mxu0 }
  0xd0   :  { %v2081_v28 = vadd.f32 %v162_v27, %v64_v25 }
  0xd1   :  { %v164_v29 = vpop.f32.mrf.mxu0 }
  0xd2   :  { %v2083_v31 = vadd.f32 %v164_v29, %v68_v22 }
  0xd3   :  { %v168_v32 = vpop.f32.mrf.mxu0  ;;  %v307_v33 = vpop.f32.mrf.mxu1 }
  0xd4   :  { %v2085_v34 = vadd.f32 %v168_v32, %v64_v25  ;;  %v314_v35 = vadd.f32 %v307_v33, %v159_v30 }
  0xd5   :  { %v170_v36 = vpop.f32.mrf.mxu0  ;;  %v309_v37 = vpop.f32.mrf.mxu1 }
  0xd6   :  { %1730 = vtanh.f32 %v314_v35  ;;  %v2087_v38 = vadd.f32 %v170_v36, %v68_v22  ;;  %v1617_v0 = vmul.f32 -1.442695, %v314_v35 }
  0xd7   :  { %v172_v39 = vpop.f32.mrf.mxu0  ;;  %v311_v40 = vpop.f32.mrf.mxu1 }
  0xd8   :  { %v2089_v41 = vadd.f32 %v172_v39, %v64_v25 }
  0xd9   :  { %v174_v42 = vpop.f32.mrf.mxu0  ;;  %v312_v43 = vpop.f32.mrf.mxu1 }
  0xda   :  { %v2091_v44 = vadd.f32 %v174_v42, %v68_v22 }
  0xdb   :  { %v178_v45 = vpop.f32.mrf.mxu0 }
  0xdc   :  { %v2093_v46 = vadd.f32 %v178_v45, %v64_v25 }
  0xdd   :  { %v180_v47 = vpop.f32.mrf.mxu0 }
  0xde   :  { %v2095_v48 = vadd.f32 %v180_v47, %v68_v22 }
  0xdf   :  { %v182_v49 = vpop.f32.mrf.mxu0 }
  0xe0   :  { %v2097_v50 = vadd.f32 %v182_v49, %v64_v25 }
  0xe1   :  { %v184_v51 = vpop.f32.mrf.mxu0 }
  0xe2   :  { %v2099_v52 = vadd.f32 %v184_v51, %v68_v22 }
  0xe3   :  { %v1731_v53 = vpop.eup %1730  ;;  %v188_v54 = vpop.f32.mrf.mxu0 }
  0xe4   :  { %v2101_v55 = vadd.f32 %v188_v54, %v64_v25  ;;  %324 = vrot.lane.b32.xlu0 %v1731_v53, %s1897_s0 }
  0xe5   :  { %v190_v56 = vpop.f32.mrf.mxu0 }
  0xe6   :  { %v2104_v57 = vadd.f32 %v190_v56, %v68_v22 }
  0xe7   :  { %v192_v58 = vpop.f32.mrf.mxu0 }
  0xe8   :  { %v2106_v59 = vadd.f32 %v192_v58, %v64_v25 }
  0xe9   :  { %v194_v60 = vpop.f32.mrf.mxu0 }
  0xea   :  { %v195_v61 = vadd.f32 %v194_v60, %v68_v22 }
  0xec   :  { %v339_v62 = vadd.f32 %v309_v37, %v195_v61 }
  0xee   :  { %1732 = vtanh.f32 %v339_v62  ;;  %v1618_v7 = vmul.f32 -1.442695, %v339_v62 }
  0xef   :  { %1734 = vpow2.f32 %v1617_v0 }
  0xfb   :  { %v1733_v63 = vpop.eup %1732 }
  0xfc   :  { %349 = vrot.lane.b32.xlu0 %v1733_v63, %s1897_s0  ;;  %v1735_v3 = vpop.eup %1734 }
  0xfd   :  { %v318_v5 = vadd.f32 1.0, %v1735_v3 }
  0xff   :  { %1736 = vrcp.f32 %v318_v5 }
 0x100   :  { %1738 = vpow2.f32 %v1618_v7 }
 0x10c   :  { %v1737_v9 = vpop.eup %1736 }
 0x10d   :  { %v1739_v16 = vpop.eup %1738  ;;  %v322_v21 = vmul.f32 0.0, %v1737_v9 }
 0x10e   :  { %v343_v17 = vadd.f32 1.0, %v1739_v16 }
 0x110   :  { %1740 = vrcp.f32 %v343_v17 }
 0x11d   :  { %v1741_v18 = vpop.eup %1740 }
 0x11e   :  { %v347_v25 = vmul.f32 0.0, %v1741_v18 }
 0x156   :  { %v325_v14 = vpop.permute.xlu0 %324 }
 0x157   :  { %v327_v15 = vmul.f32 %v1737_v9, %v325_v14 }
 0x159   :  { %329 = vrot.lane.b32.xlu1 %v327_v15, %s1897_s0 }
 0x16e   :  { %v350_v19 = vpop.permute.xlu0 %349 }
 0x16f   :  { %v352_v20 = vmul.f32 %v1741_v18, %v350_v19 }
 0x171   :  { %354 = vrot.lane.b32.xlu1 %v352_v20, %s1897_s0 }
 0x1cb   :  { %v330_v22 = vpop.permute.xlu1 %329 }
 0x1cc   :  { %v2111_v23 = vadd.f32 %v330_v22, %v322_v21 }
 0x1ce   :  { %1742 = vtanh.f32 %v2111_v23 }
 0x1db   :  { %v1743_v24 = vpop.eup %1742 }
 0x1dc   :  { %335 = vrot.lane.b32.xlu0 %v1743_v24, %s1897_s0 }
 0x1e3   :  { %v355_v27 = vpop.permute.xlu1 %354 }
 0x1e4   :  { %v2115_v29 = vadd.f32 %v355_v27, %v347_v25 }
 0x1e6   :  { %1744 = vtanh.f32 %v2115_v29 }
 0x1f3   :  { %v1745_v30 = vpop.eup %1744 }
 0x1f4   :  { %360 = vrot.lane.b32.xlu1 %v1745_v30, %s1897_s0 }
 0x24e   :  { %v336_v32 = vpop.permute.xlu0 %335 }
 0x24f   :  { %v338_v33 = vmul.f32 %v1737_v9, %v336_v32 }
 0x251   :  { %365 = vrot.lane.b32.xlu0 %v338_v33, %s1898_s4 }
 0x266   :  { %v361_v35 = vpop.permute.xlu1 %360 }
 0x267   :  { %v363_v36 = vmul.f32 %v1741_v18, %v361_v35 }
 0x269   :  { %370 = vrot.lane.b32.xlu1 %v363_v36, %s1899_s23 }
 0x2c3   :  { %v366_v37 = vpop.permute.xlu0 %365 }
 0x2c4   :  { %368 = vst.msk [vmem:[#allocation3] sm:$0xff] %vm111_vm0, %v366_v37 }
 0x2db   :  { %v371_v39 = vpop.permute.xlu1 %370 }
 0x2dc   :  { %375 = vst.msk [vmem:[#allocation3 + $0x38] sm:$0xff] %vm374_vm1, %v371_v39  ;;  %v376_v40 = vsel %vm111_vm0, %v366_v37, %v371_v39 }
 0x2dd   :  { %v385_v42 = vpack.c.bf16 %v376_v40, %v376_v40 }
 0x2df   :  { %1619 = vmatmul.mubr.msk.bf16.vlgmr.msra.gmra.mxu1 %vm269_vm2, %v385_v42 }
 0x2e0   :  { %630 = vmatpush1.bf16.msra.mxu1 %v1990_v4  ;;  %653 = vmatprep.mubr.bf16.mxu1 %v1896_v1 }
 0x2e1   :  { %631 = vmatprep.subr.bf16.mxu1 %v2000_v6 }
 0x2e4   :  { %632 = vmatpush1.bf16.msra.mxu1 %v2008_v8 }
 0x2e5   :  { %633 = vmatprep.subr.bf16.mxu1 %v2017_v10 }
 0x2e8   :  { %634 = vmatpush1.bf16.msra.mxu1 %v2023_v11 }
 0x2e9   :  { %635 = vmatprep.subr.bf16.mxu1 %v2029_v12 }
 0x2ec   :  { %636 = vmatpush1.bf16.msra.mxu1 %v2037_v13 }
 0x2ed   :  { %847 = vmatprep.subr.bf16.mxu1 %v1980_v2 }
 0x39f   :  { %v423_v43 = vpop.f32.mrf.mxu1 }
 0x3a0   :  { %v430_v45 = vadd.f32 %v423_v43, %v2081_v28 }
 0x3a1   :  { %v425_v47 = vpop.f32.mrf.mxu1 }
 0x3a2   :  { %1746 = vtanh.f32 %v430_v45  ;;  %v455_v49 = vadd.f32 %v425_v47, %v2104_v57  ;;  %v1620_v58 = vmul.f32 -1.442695, %v430_v45 }
 0x3a3   :  { %v427_v51 = vpop.f32.mrf.mxu1 }
 0x3a4   :  { %1748 = vtanh.f32 %v455_v49  ;;  %v1621_v60 = vmul.f32 -1.442695, %v455_v49 }
 0x3a5   :  { %v428_v53 = vpop.f32.mrf.mxu1  ;;  %1750 = vpow2.f32 %v1620_v58 }
 0x3a6   :  { %1752 = vpow2.f32 %v1621_v60 }
 0x3af   :  { %v1747_v54 = vpop.eup %1746 }
 0x3b0   :  { %440 = vrot.lane.b32.xlu0 %v1747_v54, %s1897_s0 }
 0x3b1   :  { %v1749_v56 = vpop.eup %1748 }
 0x3b2   :  { %465 = vrot.lane.b32.xlu1 %v1749_v56, %s1897_s0  ;;  %v1751_v61 = vpop.eup %1750 }
 0x3b3   :  { %v1753_v62 = vpop.eup %1752  ;;  %v434_v28 = vadd.f32 1.0, %v1751_v61 }
 0x3b4   :  { %v459_v63 = vadd.f32 1.0, %v1753_v62 }
 0x3b5   :  { %1754 = vrcp.f32 %v434_v28 }
 0x3b6   :  { %1756 = vrcp.f32 %v459_v63 }
 0x3c2   :  { %v1755_v57 = vpop.eup %1754 }
 0x3c3   :  { %v1757_v5 = vpop.eup %1756  ;;  %v438_v14 = vmul.f32 %v1755_v57, %v2111_v23 }
 0x3c4   :  { %v463_v17 = vmul.f32 %v1757_v5, %v2115_v29 }
 0x422   :  { %v441_v0 = vpop.permute.xlu0 %440 }
 0x423   :  { %v443_v3 = vmul.f32 %v1755_v57, %v441_v0 }
 0x424   :  { %v466_v7 = vpop.permute.xlu1 %465 }
 0x425   :  { %445 = vrot.lane.b32.xlu0 %v443_v3, %s1897_s0  ;;  %v468_v9 = vmul.f32 %v1757_v5, %v466_v7 }
 0x427   :  { %470 = vrot.lane.b32.xlu1 %v468_v9, %s1897_s0 }
 0x497   :  { %v446_v15 = vpop.permute.xlu0 %445 }
 0x498   :  { %v448_v16 = vadd.f32 %v446_v15, %v438_v14 }
 0x499   :  { %v471_v18 = vpop.permute.xlu1 %470 }
 0x49a   :  { %1758 = vtanh.f32 %v448_v16  ;;  %v473_v19 = vadd.f32 %v471_v18, %v463_v17 }
 0x49c   :  { %1760 = vtanh.f32 %v473_v19 }
 0x4a7   :  { %v1759_v20 = vpop.eup %1758 }
 0x4a8   :  { %451 = vrot.lane.b32.xlu0 %v1759_v20, %s1897_s0 }
 0x4a9   :  { %v1761_v21 = vpop.eup %1760 }
 0x4aa   :  { %476 = vrot.lane.b32.xlu1 %v1761_v21, %s1897_s0 }
 0x51a   :  { %v452_v22 = vpop.permute.xlu0 %451 }
 0x51b   :  { %v454_v24 = vmul.f32 %v1755_v57, %v452_v22 }
 0x51c   :  { %v477_v25 = vpop.permute.xlu1 %476 }
 0x51d   :  { %481 = vrot.lane.b32.xlu0 %v454_v24, %s1898_s4  ;;  %v479_v23 = vmul.f32 %v1757_v5, %v477_v25 }
 0x51f   :  { %487 = vrot.lane.b32.xlu1 %v479_v23, %s1899_s23 }
 0x58f   :  { %v482_v27 = vpop.permute.xlu0 %481 }
 0x590   :  { %485 = vst.msk [vmem:[#allocation3 + $0x8] sm:$0xff] %vm111_vm0, %v482_v27 }
 0x591   :  { %v488_v29 = vpop.permute.xlu1 %487 }
 0x592   :  { %491 = vst.msk [vmem:[#allocation3 + $0x30] sm:$0xff] %vm374_vm1, %v488_v29  ;;  %v492_v30 = vsel %vm111_vm0, %v482_v27, %v488_v29 }
 0x593   :  { %v501_v32 = vpack.c.bf16 %v492_v30, %v492_v30 }
 0x595   :  { %1622 = vmatmul.mubr.msk.bf16.vlgmr.msra.gmra.mxu0 %vm269_vm2, %v501_v32 }
 0x596   :  { %740 = vmatpush1.bf16.msra.mxu0 %v1990_v4  ;;  %763 = vmatprep.mubr.bf16.mxu0 %v1896_v1 }
 0x597   :  { %741 = vmatprep.subr.bf16.mxu0 %v2000_v6 }
 0x59a   :  { %742 = vmatpush1.bf16.msra.mxu0 %v2008_v8 }
 0x59b   :  { %743 = vmatprep.subr.bf16.mxu0 %v2017_v10 }
 0x59e   :  { %744 = vmatpush1.bf16.msra.mxu0 %v2023_v11 }
 0x59f   :  { %745 = vmatprep.subr.bf16.mxu0 %v2029_v12 }
 0x5a2   :  { %746 = vmatpush1.bf16.msra.mxu0 %v2037_v13 }
 0x5a3   :  { %955 = vmatprep.subr.bf16.mxu0 %v1980_v2 }
 0x655   :  { %v539_v33 = vpop.f32.mrf.mxu0 }
 0x656   :  { %v546_v35 = vadd.f32 %v539_v33, %v2085_v34 }
 0x657   :  { %v541_v36 = vpop.f32.mrf.mxu0 }
 0x658   :  { %1762 = vtanh.f32 %v546_v35  ;;  %v571_v37 = vadd.f32 %v541_v36, %v2099_v52  ;;  %v1623_v45 = vmul.f32 -1.442695, %v546_v35 }
 0x659   :  { %v543_v39 = vpop.f32.mrf.mxu0 }
 0x65a   :  { %1764 = vtanh.f32 %v571_v37  ;;  %v1624_v47 = vmul.f32 -1.442695, %v571_v37 }
 0x65b   :  { %v544_v40 = vpop.f32.mrf.mxu0  ;;  %1766 = vpow2.f32 %v1623_v45 }
 0x65c   :  { %1768 = vpow2.f32 %v1624_v47 }
 0x665   :  { %v1763_v42 = vpop.eup %1762 }
 0x666   :  { %556 = vrot.lane.b32.xlu0 %v1763_v42, %s1897_s0 }
 0x667   :  { %v1765_v43 = vpop.eup %1764 }
 0x668   :  { %581 = vrot.lane.b32.xlu1 %v1765_v43, %s1897_s0  ;;  %v1767_v49 = vpop.eup %1766 }
 0x669   :  { %v1769_v51 = vpop.eup %1768  ;;  %v550_v34 = vadd.f32 1.0, %v1767_v49 }
 0x66a   :  { %v575_v53 = vadd.f32 1.0, %v1769_v51 }
 0x66b   :  { %1770 = vrcp.f32 %v550_v34 }
 0x66c   :  { %1772 = vrcp.f32 %v575_v53 }
 0x678   :  { %v1771_v52 = vpop.eup %1770 }
 0x679   :  { %v1773_v58 = vpop.eup %1772  ;;  %v554_v62 = vmul.f32 %v1771_v52, %v448_v16 }
 0x67a   :  { %v579_v57 = vmul.f32 %v1773_v58, %v473_v19 }
 0x6d8   :  { %v557_v54 = vpop.permute.xlu0 %556 }
 0x6d9   :  { %v559_v56 = vmul.f32 %v1771_v52, %v557_v54 }
 0x6da   :  { %v582_v60 = vpop.permute.xlu1 %581 }
 0x6db   :  { %561 = vrot.lane.b32.xlu0 %v559_v56, %s1897_s0  ;;  %v584_v61 = vmul.f32 %v1773_v58, %v582_v60 }
 0x6dd   :  { %586 = vrot.lane.b32.xlu1 %v584_v61, %s1897_s0 }
 0x74d   :  { %v562_v28 = vpop.permute.xlu0 %561 }
 0x74e   :  { %v564_v63 = vadd.f32 %v562_v28, %v554_v62 }
 0x74f   :  { %v587_v0 = vpop.permute.xlu1 %586 }
 0x750   :  { %1774 = vtanh.f32 %v564_v63  ;;  %v589_v3 = vadd.f32 %v587_v0, %v579_v57 }
 0x752   :  { %1776 = vtanh.f32 %v589_v3 }
 0x75d   :  { %v1775_v5 = vpop.eup %1774 }
 0x75e   :  { %567 = vrot.lane.b32.xlu0 %v1775_v5, %s1897_s0 }
 0x75f   :  { %v1777_v7 = vpop.eup %1776 }
 0x760   :  { %592 = vrot.lane.b32.xlu1 %v1777_v7, %s1897_s0 }
 0x7d0   :  { %v568_v9 = vpop.permute.xlu0 %567 }
 0x7d1   :  { %v570_v14 = vmul.f32 %v1771_v52, %v568_v9 }
 0x7d2   :  { %v593_v15 = vpop.permute.xlu1 %592 }
 0x7d3   :  { %597 = vrot.lane.b32.xlu0 %v570_v14, %s1898_s4  ;;  %v595_v17 = vmul.f32 %v1773_v58, %v593_v15 }
 0x7d5   :  { %603 = vrot.lane.b32.xlu1 %v595_v17, %s1899_s23 }
 0x845   :  { %v598_v16 = vpop.permute.xlu0 %597 }
 0x846   :  { %601 = vst.msk [vmem:[#allocation3 + $0x10] sm:$0xff] %vm111_vm0, %v598_v16 }
 0x847   :  { %v604_v18 = vpop.permute.xlu1 %603 }
 0x848   :  { %607 = vst.msk [vmem:[#allocation3 + $0x28] sm:$0xff] %vm374_vm1, %v604_v18  ;;  %v608_v19 = vsel %vm111_vm0, %v598_v16, %v604_v18 }
 0x849   :  { %v617_v20 = vpack.c.bf16 %v608_v19, %v608_v19 }
 0x84b   :  { %1625 = vmatmul.mubr.msk.bf16.vlgmr.msra.gmra.mxu1 %vm269_vm2, %v617_v20 }
 0x84c   :  { %848 = vmatpush1.bf16.msra.mxu1 %v1990_v4  ;;  %871 = vmatprep.mubr.bf16.mxu1 %v1896_v1 }
 0x84d   :  { %849 = vmatprep.subr.bf16.mxu1 %v2000_v6 }
 0x850   :  { %850 = vmatpush1.bf16.msra.mxu1 %v2008_v8 }
 0x851   :  { %851 = vmatprep.subr.bf16.mxu1 %v2017_v10 }
 0x854   :  { %852 = vmatpush1.bf16.msra.mxu1 %v2023_v11 }
 0x855   :  { %853 = vmatprep.subr.bf16.mxu1 %v2029_v12 }
 0x858   :  { %854 = vmatpush1.bf16.msra.mxu1 %v2037_v13 }
 0x859   :  { %1063 = vmatprep.subr.bf16.mxu1 %v1980_v2 }
 0x90b   :  { %v655_v21 = vpop.f32.mrf.mxu1 }
 0x90c   :  { %v662_v22 = vadd.f32 %v655_v21, %v2089_v41 }
 0x90d   :  { %v657_v24 = vpop.f32.mrf.mxu1 }
 0x90e   :  { %1778 = vtanh.f32 %v662_v22  ;;  %v687_v25 = vadd.f32 %v657_v24, %v2095_v48  ;;  %v1626_v32 = vmul.f32 -1.442695, %v662_v22 }
 0x90f   :  { %v659_v23 = vpop.f32.mrf.mxu1 }
 0x910   :  { %1780 = vtanh.f32 %v687_v25  ;;  %v1627_v33 = vmul.f32 -1.442695, %v687_v25 }
 0x911   :  { %v660_v27 = vpop.f32.mrf.mxu1  ;;  %1782 = vpow2.f32 %v1626_v32 }
 0x912   :  { %1784 = vpow2.f32 %v1627_v33 }
 0x91b   :  { %v1779_v29 = vpop.eup %1778 }
 0x91c   :  { %672 = vrot.lane.b32.xlu0 %v1779_v29, %s1897_s0 }
 0x91d   :  { %v1781_v30 = vpop.eup %1780 }
 0x91e   :  { %697 = vrot.lane.b32.xlu1 %v1781_v30, %s1897_s0  ;;  %v1783_v2 = vpop.eup %1782 }
 0x91f   :  { %v1785_v35 = vpop.eup %1784  ;;  %v666_v41 = vadd.f32 1.0, %v1783_v2 }
 0x920   :  { %v691_v36 = vadd.f32 1.0, %v1785_v35 }
 0x921   :  { %1786 = vrcp.f32 %v666_v41 }
 0x922   :  { %1788 = vrcp.f32 %v691_v36 }
 0x92e   :  { %v1787_v48 = vpop.eup %1786 }
 0x92f   :  { %v1789_v40 = vpop.eup %1788  ;;  %v670_v45 = vmul.f32 %v1787_v48, %v564_v63 }
 0x930   :  { %v695_v51 = vmul.f32 %v1789_v40, %v589_v3 }
 0x98e   :  { %v673_v37 = vpop.permute.xlu0 %672 }
 0x98f   :  { %v675_v39 = vmul.f32 %v1787_v48, %v673_v37 }
 0x990   :  { %v698_v42 = vpop.permute.xlu1 %697 }
 0x991   :  { %677 = vrot.lane.b32.xlu0 %v675_v39, %s1897_s0  ;;  %v700_v43 = vmul.f32 %v1789_v40, %v698_v42 }
 0x993   :  { %702 = vrot.lane.b32.xlu1 %v700_v43, %s1897_s0 }
 0xa03   :  { %v678_v47 = vpop.permute.xlu0 %677 }
 0xa04   :  { %v680_v49 = vadd.f32 %v678_v47, %v670_v45 }
 0xa05   :  { %v703_v34 = vpop.permute.xlu1 %702 }
 0xa06   :  { %1790 = vtanh.f32 %v680_v49  ;;  %v705_v53 = vadd.f32 %v703_v34, %v695_v51 }
 0xa08   :  { %1792 = vtanh.f32 %v705_v53 }
 0xa13   :  { %v1791_v52 = vpop.eup %1790 }
 0xa14   :  { %683 = vrot.lane.b32.xlu0 %v1791_v52, %s1897_s0 }
 0xa15   :  { %v1793_v54 = vpop.eup %1792 }
 0xa16   :  { %708 = vrot.lane.b32.xlu1 %v1793_v54, %s1897_s0 }
 0xa86   :  { %v684_v56 = vpop.permute.xlu0 %683 }
 0xa87   :  { %v686_v58 = vmul.f32 %v1787_v48, %v684_v56 }
 0xa88   :  { %v709_v60 = vpop.permute.xlu1 %708 }
 0xa89   :  { %713 = vrot.lane.b32.xlu0 %v686_v58, %s1898_s4  ;;  %v711_v61 = vmul.f32 %v1789_v40, %v709_v60 }
 0xa8b   :  { %719 = vrot.lane.b32.xlu1 %v711_v61, %s1899_s23 }
 0xafb   :  { %v714_v62 = vpop.permute.xlu0 %713 }
 0xafc   :  { %717 = vst.msk [vmem:[#allocation3 + $0x18] sm:$0xff] %vm111_vm0, %v714_v62 }
 0xafd   :  { %v720_v28 = vpop.permute.xlu1 %719 }
 0xafe   :  { %723 = vst.msk [vmem:[#allocation3 + $0x20] sm:$0xff] %vm374_vm1, %v720_v28  ;;  %v724_v63 = vsel %vm111_vm0, %v714_v62, %v720_v28 }
 0xaff   :  { %v727_v57 = vpack.c.bf16 %v724_v63, %v724_v63 }
 0xb01   :  { %1628 = vmatmul.mubr.msk.bf16.vlgmr.msra.gmra.mxu0 %vm269_vm2, %v727_v57 }
 0xb02   :  { %956 = vmatpush1.bf16.msra.mxu0 %v1990_v4  ;;  %979 = vmatprep.mubr.bf16.mxu0 %v1896_v1 }
 0xb03   :  { %957 = vmatprep.subr.bf16.mxu0 %v2000_v6 }
 0xb06   :  { %958 = vmatpush1.bf16.msra.mxu0 %v2008_v8 }
 0xb07   :  { %959 = vmatprep.subr.bf16.mxu0 %v2017_v10 }
 0xb0a   :  { %960 = vmatpush1.bf16.msra.mxu0 %v2023_v11 }
 0xb0b   :  { %961 = vmatprep.subr.bf16.mxu0 %v2029_v12 }
 0xb0e   :  { %962 = vmatpush1.bf16.msra.mxu0 %v2037_v13 }
 0xbc1   :  { %v765_v0 = vpop.f32.mrf.mxu0 }
 0xbc2   :  { %v772_v3 = vadd.f32 %v765_v0, %v2093_v46 }
 0xbc3   :  { %v767_v5 = vpop.f32.mrf.mxu0 }
 0xbc4   :  { %1794 = vtanh.f32 %v772_v3  ;;  %v797_v7 = vadd.f32 %v767_v5, %v2091_v44  ;;  %v1629_v16 = vmul.f32 -1.442695, %v772_v3 }
 0xbc5   :  { %v769_v9 = vpop.f32.mrf.mxu0 }
 0xbc6   :  { %1796 = vtanh.f32 %v797_v7  ;;  %v1630_v18 = vmul.f32 -1.442695, %v797_v7 }
 0xbc7   :  { %v770_v14 = vpop.f32.mrf.mxu0  ;;  %1798 = vpow2.f32 %v1629_v16 }
 0xbc8   :  { %1800 = vpow2.f32 %v1630_v18 }
 0xbd1   :  { %v1795_v15 = vpop.eup %1794 }
 0xbd2   :  { %782 = vrot.lane.b32.xlu0 %v1795_v15, %s1897_s0 }
 0xbd3   :  { %v1797_v17 = vpop.eup %1796 }
 0xbd4   :  { %807 = vrot.lane.b32.xlu1 %v1797_v17, %s1897_s0  ;;  %v1799_v19 = vpop.eup %1798 }
 0xbd5   :  { %v1801_v20 = vpop.eup %1800  ;;  %v776_v46 = vadd.f32 1.0, %v1799_v19 }
 0xbd6   :  { %v801_v21 = vadd.f32 1.0, %v1801_v20 }
 0xbd7   :  { %1802 = vrcp.f32 %v776_v46 }
 0xbd8   :  { %1804 = vrcp.f32 %v801_v21 }
 0xbe4   :  { %v1803_v44 = vpop.eup %1802 }
 0xbe5   :  { %v1805_v25 = vpop.eup %1804  ;;  %v780_v29 = vmul.f32 %v1803_v44, %v680_v49 }
 0xbe6   :  { %v805_v33 = vmul.f32 %v1805_v25, %v705_v53 }
 0xc44   :  { %v783_v22 = vpop.permute.xlu0 %782 }
 0xc45   :  { %v785_v24 = vmul.f32 %v1803_v44, %v783_v22 }
 0xc46   :  { %v808_v23 = vpop.permute.xlu1 %807 }
 0xc47   :  { %787 = vrot.lane.b32.xlu0 %v785_v24, %s1897_s0  ;;  %v810_v27 = vmul.f32 %v1805_v25, %v808_v23 }
 0xc49   :  { %812 = vrot.lane.b32.xlu1 %v810_v27, %s1897_s0 }
 0xcb9   :  { %v788_v30 = vpop.permute.xlu0 %787 }
 0xcba   :  { %v790_v32 = vadd.f32 %v788_v30, %v780_v29 }
 0xcbb   :  { %v813_v2 = vpop.permute.xlu1 %812 }
 0xcbc   :  { %1806 = vtanh.f32 %v790_v32  ;;  %v815_v35 = vadd.f32 %v813_v2, %v805_v33 }
 0xcbe   :  { %1808 = vtanh.f32 %v815_v35 }
 0xcc9   :  { %v1807_v41 = vpop.eup %1806 }
 0xcca   :  { %793 = vrot.lane.b32.xlu0 %v1807_v41, %s1897_s0 }
 0xccb   :  { %v1809_v36 = vpop.eup %1808 }
 0xccc   :  { %818 = vrot.lane.b32.xlu1 %v1809_v36, %s1897_s0 }
 0xd3c   :  { %v794_v48 = vpop.permute.xlu0 %793 }
 0xd3d   :  { %v796_v37 = vmul.f32 %v1803_v44, %v794_v48 }
 0xd3e   :  { %v819_v39 = vpop.permute.xlu1 %818 }
 0xd3f   :  { %823 = vrot.lane.b32.xlu0 %v796_v37, %s1898_s4  ;;  %v821_v40 = vmul.f32 %v1805_v25, %v819_v39 }
 0xd41   :  { %828 = vrot.lane.b32.xlu1 %v821_v40, %s1899_s23 }
 0xdb1   :  { %v824_v42 = vpop.permute.xlu0 %823 }
 0xdb2   :  { %826 = vst.msk [vmem:[#allocation3 + $0x20] sm:$0xff] %vm111_vm0, %v824_v42 }
 0xdb3   :  { %v829_v43 = vpop.permute.xlu1 %828 }
 0xdb4   :  { %831 = vst.msk [vmem:[#allocation3 + $0x18] sm:$0xff] %vm374_vm1, %v829_v43  ;;  %v832_v45 = vsel %vm111_vm0, %v824_v42, %v829_v43 }
 0xdb5   :  { %v835_v47 = vpack.c.bf16 %v832_v45, %v832_v45 }
 0xdb7   :  { %1631 = vmatmul.mubr.msk.bf16.vlgmr.msra.gmra.mxu1 %vm269_vm2, %v835_v47 }
 0xdb8   :  { %1064 = vmatpush1.bf16.msra.mxu1 %v1990_v4  ;;  %1087 = vmatprep.mubr.bf16.mxu1 %v1896_v1 }
 0xdb9   :  { %1065 = vmatprep.subr.bf16.mxu1 %v2000_v6 }
 0xdbc   :  { %1066 = vmatpush1.bf16.msra.mxu1 %v2008_v8 }
 0xdbd   :  { %1067 = vmatprep.subr.bf16.mxu1 %v2017_v10 }
 0xdc0   :  { %1068 = vmatpush1.bf16.msra.mxu1 %v2023_v11 }
 0xdc1   :  { %1069 = vmatprep.subr.bf16.mxu1 %v2029_v12 }
 0xdc4   :  { %1070 = vmatpush1.bf16.msra.mxu1 %v2037_v13 }
 0xe77   :  { %v873_v49 = vpop.f32.mrf.mxu1 }
 0xe78   :  { %v880_v51 = vadd.f32 %v873_v49, %v2097_v50 }
 0xe79   :  { %v875_v34 = vpop.f32.mrf.mxu1 }
 0xe7a   :  { %1810 = vtanh.f32 %v880_v51  ;;  %v905_v4 = vadd.f32 %v875_v34, %v2087_v38  ;;  %v1632_v10 = vmul.f32 -1.442695, %v880_v51 }
 0xe7b   :  { %v877_v1 = vpop.f32.mrf.mxu1 }
 0xe7c   :  { %1812 = vtanh.f32 %v905_v4  ;;  %v1633_v11 = vmul.f32 -1.442695, %v905_v4 }
 0xe7d   :  { %v878_v6 = vpop.f32.mrf.mxu1  ;;  %1814 = vpow2.f32 %v1632_v10 }
 0xe7e   :  { %1816 = vpow2.f32 %v1633_v11 }
 0xe87   :  { %v1811_v53 = vpop.eup %1810 }
 0xe88   :  { %890 = vrot.lane.b32.xlu0 %v1811_v53, %s1897_s0 }
 0xe89   :  { %v1813_v8 = vpop.eup %1812 }
 0xe8a   :  { %915 = vrot.lane.b32.xlu1 %v1813_v8, %s1897_s0  ;;  %v1815_v12 = vpop.eup %1814 }
 0xe8b   :  { %v1817_v13 = vpop.eup %1816  ;;  %v884_v50 = vadd.f32 1.0, %v1815_v12 }
 0xe8c   :  { %v909_v52 = vadd.f32 1.0, %v1817_v13 }
 0xe8d   :  { %1818 = vrcp.f32 %v884_v50 }
 0xe8e   :  { %1820 = vrcp.f32 %v909_v52 }
 0xe9a   :  { %v1819_v38 = vpop.eup %1818 }
 0xe9b   :  { %v1821_v58 = vpop.eup %1820  ;;  %v888_v62 = vmul.f32 %v1819_v38, %v790_v32 }
 0xe9c   :  { %v913_v57 = vmul.f32 %v1821_v58, %v815_v35 }
 0xefa   :  { %v891_v54 = vpop.permute.xlu0 %890 }
 0xefb   :  { %v893_v56 = vmul.f32 %v1819_v38, %v891_v54 }
 0xefc   :  { %v916_v60 = vpop.permute.xlu1 %915 }
 0xefd   :  { %895 = vrot.lane.b32.xlu0 %v893_v56, %s1897_s0  ;;  %v918_v61 = vmul.f32 %v1821_v58, %v916_v60 }
 0xeff   :  { %920 = vrot.lane.b32.xlu1 %v918_v61, %s1897_s0 }
 0xf6f   :  { %v896_v28 = vpop.permute.xlu0 %895 }
 0xf70   :  { %v898_v63 = vadd.f32 %v896_v28, %v888_v62 }
 0xf71   :  { %v921_v0 = vpop.permute.xlu1 %920 }
 0xf72   :  { %1822 = vtanh.f32 %v898_v63  ;;  %v923_v3 = vadd.f32 %v921_v0, %v913_v57 }
 0xf74   :  { %1824 = vtanh.f32 %v923_v3 }
 0xf7f   :  { %v1823_v5 = vpop.eup %1822 }
 0xf80   :  { %901 = vrot.lane.b32.xlu0 %v1823_v5, %s1897_s0 }
 0xf81   :  { %v1825_v7 = vpop.eup %1824 }
 0xf82   :  { %926 = vrot.lane.b32.xlu1 %v1825_v7, %s1897_s0 }
 0xff2   :  { %v902_v9 = vpop.permute.xlu0 %901 }
 0xff3   :  { %v904_v14 = vmul.f32 %v1819_v38, %v902_v9 }
 0xff4   :  { %v927_v15 = vpop.permute.xlu1 %926 }
 0xff5   :  { %931 = vrot.lane.b32.xlu0 %v904_v14, %s1898_s4  ;;  %v929_v17 = vmul.f32 %v1821_v58, %v927_v15 }
 0xff7   :  { %936 = vrot.lane.b32.xlu1 %v929_v17, %s1899_s23 }
0x1067   :  { %v932_v16 = vpop.permute.xlu0 %931 }
0x1068   :  { %934 = vst.msk [vmem:[#allocation3 + $0x28] sm:$0xff] %vm111_vm0, %v932_v16 }
0x1069   :  { %v937_v18 = vpop.permute.xlu1 %936 }
0x106a   :  { %939 = vst.msk [vmem:[#allocation3 + $0x10] sm:$0xff] %vm374_vm1, %v937_v18  ;;  %v940_v19 = vsel %vm111_vm0, %v932_v16, %v937_v18 }
0x106b   :  { %v943_v20 = vpack.c.bf16 %v940_v19, %v940_v19 }
0x106d   :  { %1634 = vmatmul.mubr.msk.bf16.vlgmr.msra.gmra.mxu0 %vm269_vm2, %v943_v20  ;;  %v1156_v20 = vld [vmem:[%s2389_s1] sm:$0xff] }
0x112d   :  { %v981_v46 = vpop.f32.mrf.mxu0 }
0x112e   :  { %v988_v21 = vadd.f32 %v981_v46, %v2101_v55 }
0x112f   :  { %v983_v44 = vpop.f32.mrf.mxu0 }
0x1130   :  { %1826 = vtanh.f32 %v988_v21  ;;  %v1013_v22 = vadd.f32 %v983_v44, %v2083_v31  ;;  %v1635_v29 = vmul.f32 -1.442695, %v988_v21  ;;  %v1157_v21 = vld [vmem:[%s2389_s1 + $0x8] sm:$0xff]  ;;  %v1159_v44 = vld [vmem:[%s2389_s1 + $0x18] sm:$0xff] }
0x1131   :  { %v985_v24 = vpop.f32.mrf.mxu0 }
0x1132   :  { %1828 = vtanh.f32 %v1013_v22  ;;  %v1636_v30 = vmul.f32 -1.442695, %v1013_v22  ;;  %v1158_v22 = vld [vmem:[%s2389_s1 + $0x10] sm:$0xff]  ;;  %v1161_v24 = vld [vmem:[%s2389_s1 + $0x28] sm:$0xff] }
0x1133   :  { %v986_v25 = vpop.f32.mrf.mxu0  ;;  %1830 = vpow2.f32 %v1635_v29 }
0x1134   :  { %1832 = vpow2.f32 %v1636_v30  ;;  %v1160_v25 = vld [vmem:[%s2389_s1 + $0x20] sm:$0xff] }
0x113d   :  { %v1827_v23 = vpop.eup %1826 }
0x113e   :  { %998 = vrot.lane.b32.xlu0 %v1827_v23, %s1897_s0 }
0x113f   :  { %v1829_v27 = vpop.eup %1828 }
0x1140   :  { %1023 = vrot.lane.b32.xlu1 %v1829_v27, %s1897_s0  ;;  %v1831_v32 = vpop.eup %1830 }
0x1141   :  { %v1833_v33 = vpop.eup %1832  ;;  %v992_v55 = vadd.f32 1.0, %v1831_v32  ;;  %v1163_v32 = vld [vmem:[%s2389_s1 + $0x38] sm:$0xff] }
0x1142   :  { %v1017_v2 = vadd.f32 1.0, %v1833_v33  ;;  %v1162_v33 = vld [vmem:[%s2389_s1 + $0x30] sm:$0xff] }
0x1143   :  { %1834 = vrcp.f32 %v992_v55 }
0x1144   :  { %1836 = vrcp.f32 %v1017_v2 }
0x1150   :  { %v1835_v31 = vpop.eup %1834 }
0x1151   :  { %v1837_v36 = vpop.eup %1836  ;;  %v996_v39 = vmul.f32 %v1835_v31, %v898_v63 }
0x1152   :  { %v1021_v43 = vmul.f32 %v1837_v36, %v923_v3 }
0x11b0   :  { %v999_v35 = vpop.permute.xlu0 %998 }
0x11b1   :  { %v1001_v41 = vmul.f32 %v1835_v31, %v999_v35 }
0x11b2   :  { %v1024_v48 = vpop.permute.xlu1 %1023 }
0x11b3   :  { %1003 = vrot.lane.b32.xlu0 %v1001_v41, %s1897_s0  ;;  %v1026_v37 = vmul.f32 %v1837_v36, %v1024_v48  ;;  %v1166_v48 = vld [vmem:[#allocation3 + $0x10] sm:$0xff] }
0x11b5   :  { %1028 = vrot.lane.b32.xlu1 %v1026_v37, %s1897_s0 }
0x1225   :  { %v1004_v40 = vpop.permute.xlu0 %1003 }
0x1226   :  { %v1006_v42 = vadd.f32 %v1004_v40, %v996_v39 }
0x1227   :  { %v1029_v45 = vpop.permute.xlu1 %1028 }
0x1228   :  { %1838 = vtanh.f32 %v1006_v42  ;;  %v1031_v47 = vadd.f32 %v1029_v45, %v1021_v43  ;;  %v1169_v43 = vld [vmem:[#allocation3 + $0x28] sm:$0xff]  ;;  %v1168_v45 = vld [vmem:[#allocation3 + $0x20] sm:$0xff] }
0x122a   :  { %1840 = vtanh.f32 %v1031_v47 }
0x1235   :  { %v1839_v49 = vpop.eup %1838 }
0x1236   :  { %1009 = vrot.lane.b32.xlu0 %v1839_v49, %s1897_s0 }
0x1237   :  { %v1841_v51 = vpop.eup %1840 }
0x1238   :  { %1034 = vrot.lane.b32.xlu1 %v1841_v51, %s1897_s0 }
0x12a8   :  { %v1010_v34 = vpop.permute.xlu0 %1009 }
0x12a9   :  { %v1012_v4 = vmul.f32 %v1835_v31, %v1010_v34  ;;  %v18_v34 = vstv %s2390_s6 }
0x12aa   :  { %v1035_v1 = vpop.permute.xlu1 %1034  ;;  %19 = vst [vmem:[#allocation4] sm:$0x1] %v18_v34 }
0x12ab   :  { %1039 = vrot.lane.b32.xlu0 %v1012_v4, %s1898_s4  ;;  %v1037_v6 = vmul.f32 %v1837_v36, %v1035_v1  ;;  %v1167_v36 = vld [vmem:[#allocation3 + $0x18] sm:$0xff]  ;;  %v1640_v4 = vld [vmem:[%s2391_s5] ss:$0 sm:$0xff] }
0x12ad   :  { %1044 = vrot.lane.b32.xlu1 %v1037_v6, %s1899_s23 }
0x131d   :  { %v1040_v53 = vpop.permute.xlu0 %1039 }
0x131e   :  { %1042 = vst.msk [vmem:[#allocation3 + $0x30] sm:$0xff] %vm111_vm0, %v1040_v53 }
0x131f   :  { %v1045_v8 = vpop.permute.xlu1 %1044 }
0x1320   :  { %1047 = vst.msk [vmem:[#allocation3 + $0x8] sm:$0xff] %vm374_vm1, %v1045_v8  ;;  %v1048_v10 = vsel %vm111_vm0, %v1040_v53, %v1045_v8 }
0x1321   :  { %v1051_v11 = vpack.c.bf16 %v1048_v10, %v1048_v10 }
0x1323   :  { %1637 = vmatmul.mubr.msk.bf16.vlgmr.msra.gmra.mxu1 %vm269_vm2, %v1051_v11 }
0x1327   :  { %v1165_v2 = vld [vmem:[#allocation3 + $0x8] sm:$0xff] }
0x13e3   :  { %v1089_v12 = vpop.f32.mrf.mxu1 }
0x13e4   :  { %v1096_v13 = vadd.f32 %v1089_v12, %v2106_v59 }
0x13e5   :  { %v1091_v50 = vpop.f32.mrf.mxu1 }
0x13e6   :  { %1842 = vtanh.f32 %v1096_v13  ;;  %v1121_v52 = vadd.f32 %v1091_v50, %v2079_v26  ;;  %v1638_v60 = vmul.f32 -1.442695, %v1096_v13 }
0x13e7   :  { %v1093_v38 = vpop.f32.mrf.mxu1 }
0x13e8   :  { %1844 = vtanh.f32 %v1121_v52  ;;  %v1639_v61 = vmul.f32 -1.442695, %v1121_v52 }
0x13e9   :  { %v1094_v54 = vpop.f32.mrf.mxu1  ;;  %1846 = vpow2.f32 %v1638_v60 }
0x13ea   :  { %1848 = vpow2.f32 %v1639_v61 }
0x13f3   :  { %v1843_v56 = vpop.eup %1842 }
0x13f4   :  { %1106 = vrot.lane.b32.xlu0 %v1843_v56, %s1897_s0 }
0x13f5   :  { %v1845_v58 = vpop.eup %1844 }
0x13f6   :  { %1131 = vrot.lane.b32.xlu1 %v1845_v58, %s1897_s0  ;;  %v1847_v62 = vpop.eup %1846 }
0x13f7   :  { %v1849_v28 = vpop.eup %1848  ;;  %v1100_v59 = vadd.f32 1.0, %v1847_v62 }
0x13f8   :  { %v1125_v63 = vadd.f32 1.0, %v1849_v28 }
0x13f9   :  { %1850 = vrcp.f32 %v1100_v59 }
0x13fa   :  { %1852 = vrcp.f32 %v1125_v63 }
0x1406   :  { %v1851_v26 = vpop.eup %1850 }
0x1407   :  { %v1853_v3 = vpop.eup %1852  ;;  %v1104_v9 = vmul.f32 %v1851_v26, %v1006_v42 }
0x1408   :  { %v1129_v17 = vmul.f32 %v1853_v3, %v1031_v47 }
0x1466   :  { %v1107_v57 = vpop.permute.xlu0 %1106 }
0x1467   :  { %v1109_v0 = vmul.f32 %v1851_v26, %v1107_v57 }
0x1468   :  { %v1132_v5 = vpop.permute.xlu1 %1131 }
0x1469   :  { %1111 = vrot.lane.b32.xlu0 %v1109_v0, %s1897_s0  ;;  %v1134_v7 = vmul.f32 %v1853_v3, %v1132_v5  ;;  %v1170_v0 = vld [vmem:[#allocation3 + $0x30] sm:$0xff] }
0x146b   :  { %1136 = vrot.lane.b32.xlu1 %v1134_v7, %s1897_s0 }
0x14db   :  { %v1112_v14 = vpop.permute.xlu0 %1111 }
0x14dc   :  { %v1114_v15 = vadd.f32 %v1112_v14, %v1104_v9 }
0x14dd   :  { %v1137_v16 = vpop.permute.xlu1 %1136 }
0x14de   :  { %1854 = vtanh.f32 %v1114_v15  ;;  %v1139_v18 = vadd.f32 %v1137_v16, %v1129_v17 }
0x14e0   :  { %1856 = vtanh.f32 %v1139_v18 }
0x14eb   :  { %v1855_v19 = vpop.eup %1854 }
0x14ec   :  { %1117 = vrot.lane.b32.xlu0 %v1855_v19, %s1897_s0 }
0x14ed   :  { %v1857_v46 = vpop.eup %1856 }
0x14ee   :  { %1142 = vrot.lane.b32.xlu1 %v1857_v46, %s1897_s0 }
0x14f0   :  { %1174 = vperm.xlu0 %1698, %v1156_v20  }
0x14f2   :  { %1179 = vperm.xlu1 %1699, %v1157_v21  }
0x14f4   :  { %1189 = vperm.xlu0 %1698, %v1159_v44  }
0x14f6   :  { %1184 = vperm.xlu1 %1699, %v1158_v22  }
0x14f8   :  { %1199 = vperm.xlu0 %1698, %v1161_v24  }
0x14fa   :  { %1194 = vperm.xlu1 %1699, %v1160_v25   ;;  %v1641_v25 = vld [vmem:[#allocation4] ss:$0 sm:$0xff] }
0x155e   :  { %v1118_v23 = vpop.permute.xlu0 %1117 }
0x155f   :  { %v1120_v27 = vmul.f32 %v1851_v26, %v1118_v23 }
0x1560   :  { %v1143_v29 = vpop.permute.xlu1 %1142 }
0x1561   :  { %1147 = vrot.lane.b32.xlu0 %v1120_v27, %s1898_s4  ;;  %v1145_v30 = vmul.f32 %v1853_v3, %v1143_v29 }
0x1563   :  { %1152 = vrot.lane.b32.xlu1 %v1145_v30, %s1899_s23 }
0x1565   :  { %1209 = vperm.xlu0 %1698, %v1163_v32  }
0x1567   :  { %1204 = vperm.xlu1 %1699, %v1162_v33  }
0x156b   :  { %v1175_v55 = vpop.permute.xlu0 %1174 }
0x156d   :  { %v1180_v31 = vpop.permute.xlu1 %1179 }
0x156e   :  { %v2288_v35 = vmul.f32 %v1180_v31, %v1165_v2 }
0x156f   :  { %v1190_v41 = vpop.permute.xlu0 %1189 }
0x1570   :  { %1858 = vtanh.f32 %v2288_v35  ;;  %v2291_v39 = vmul.f32 %v1190_v41, %v1167_v36 }
0x1571   :  { %v1185_v37 = vpop.permute.xlu1 %1184 }
0x1572   :  { %v2293_v40 = vmul.f32 %v1185_v37, %v1166_v48 }
0x1573   :  { %v1200_v42 = vpop.permute.xlu0 %1199 }
0x1574   :  { %1860 = vtanh.f32 %v2293_v40  ;;  %v2297_v49 = vmul.f32 %v1200_v42, %v1169_v43 }
0x1575   :  { %v1195_v47 = vpop.permute.xlu1 %1194  ;;  %1862 = vtanh.f32 %v2291_v39 }
0x1576   :  { %v2299_v51 = vmul.f32 %v1195_v47, %v1168_v45 }
0x1578   :  { %1864 = vtanh.f32 %v2299_v51 }
0x1579   :  { %1866 = vtanh.f32 %v2297_v49 }
0x157d   :  { %v1859_v1 = vpop.eup %1858 }
0x157e   :  { %v1236_v6 = vmul.f32 %v1859_v1, %v1640_v4 }
0x1580   :  { %v1246_v8 = vsel %vm269_vm2, %v1236_v6, 0.0 }
0x1581   :  { %v1861_v53 = vpop.eup %1860 }
0x1582   :  { %v1237_v10 = vmul.f32 %v1861_v53, %v1640_v4  ;;  %v1863_v11 = vpop.eup %1862 }
0x1583   :  { %v1238_v50 = vmul.f32 %v1863_v11, %v1640_v4 }
0x1584   :  { %1247 = vadd.xlane.f32.xlu0 %v1246_v8  ;;  %v1249_v13 = vsel %vm269_vm2, %v1237_v10, 0.0 }
0x1585   :  { %v1865_v12 = vpop.eup %1864  ;;  %v1252_v54 = vsel %vm269_vm2, %v1238_v50, 0.0 }
0x1586   :  { %v1239_v52 = vmul.f32 %v1865_v12, %v1640_v4  ;;  %v1867_v38 = vpop.eup %1866 }
0x1587   :  { %v1240_v58 = vmul.f32 %v1867_v38, %v1640_v4 }
0x1588   :  { %1250 = vadd.xlane.f32.xlu0 %v1249_v13  ;;  %v1255_v56 = vsel %vm269_vm2, %v1239_v52, 0.0 }
0x1589   :  { %v1258_v60 = vsel %vm269_vm2, %v1240_v58, 0.0 }
0x158b   :  { %1253 = vadd.xlane.f32.xlu1 %v1252_v54 }
0x158c   :  { %1256 = vadd.xlane.f32.xlu0 %v1255_v56 }
0x158f   :  { %1259 = vadd.xlane.f32.xlu1 %v1258_v60 }
0x15d3   :  { %v1148_v61 = vpop.permute.xlu0 %1147 }
0x15d4   :  { %1150 = vst.msk [vmem:[#allocation3 + $0x38] sm:$0xff] %vm111_vm0, %v1148_v61 }
0x15d5   :  { %v1153_v62 = vpop.permute.xlu1 %1152 }
0x15d6   :  { %1155 = vst.msk [vmem:[#allocation3] sm:$0xff] %vm374_vm1, %v1153_v62 }
0x15db   :  { %v1171_v63 = vld [vmem:[#allocation3 + $0x38] sm:$0xff] }
0x15dd   :  { %v1164_v28 = vld [vmem:[#allocation3] sm:$0xff] }
0x15de   :  { %v2316_v59 = vmul.f32 %v1175_v55, %v1164_v28 }
0x15e0   :  { %v1210_v26 = vpop.permute.xlu0 %1209  ;;  %1868 = vtanh.f32 %v2316_v59 }
0x15e1   :  { %v2318_v57 = vmul.f32 %v1210_v26, %v1171_v63 }
0x15e2   :  { %v1205_v3 = vpop.permute.xlu1 %1204 }
0x15e3   :  { %1870 = vtanh.f32 %v2318_v57  ;;  %v2322_v5 = vmul.f32 %v1205_v3, %v1170_v0 }
0x15e5   :  { %1872 = vtanh.f32 %v2322_v5 }
0x15ed   :  { %v1869_v7 = vpop.eup %1868 }
0x15ee   :  { %v1235_v9 = vmul.f32 %v1869_v7, %v1640_v4 }
0x15f0   :  { %v1871_v14 = vpop.eup %1870  ;;  %v1243_v15 = vsel %vm269_vm2, %v1235_v9, 0.0 }
0x15f1   :  { %v1242_v17 = vmul.f32 %v1871_v14, %v1640_v4  ;;  %1244 = vadd.xlane.f32.xlu1 %v1243_v15 }
0x15f2   :  { %v1873_v16 = vpop.eup %1872 }
0x15f3   :  { %v1264_v18 = vsel %vm269_vm2, %v1242_v17, 0.0  ;;  %v1241_v19 = vmul.f32 %v1873_v16, %v1640_v4 }
0x15f5   :  { %1265 = vadd.xlane.f32.xlu1 %v1264_v18  ;;  %v1261_v20 = vsel %vm269_vm2, %v1241_v19, 0.0 }
0x15f6   :  { %1262 = vadd.xlane.f32.xlu0 %v1261_v20 }
0x160d   :  { %v1248_v46 = vpop.xlane.xlu0 %1247 }
0x160e   :  { %v1275_v33 = vadd.f32 %v1641_v25, %v1248_v46 }
0x1610   :  { %v1284_v34 = vsel %vm1282_vm3, %v1275_v33, -inf }
0x1611   :  { %v1251_v44 = vpop.xlane.xlu0 %1250 }
0x1612   :  { %v1276_v55 = vadd.f32 %v1641_v25, %v1251_v44 }
0x1614   :  { %v1254_v21 = vpop.xlane.xlu1 %1253  ;;  %v1285_v4 = vsel %vm1282_vm3, %v1276_v55, -inf }
0x1615   :  { %v1257_v24 = vpop.xlane.xlu0 %1256  ;;  %v1277_v32 = vadd.f32 %v1641_v25, %v1254_v21 }
0x1616   :  { %v1278_v29 = vadd.f32 %v1641_v25, %v1257_v24 }
0x1617   :  { %v1286_v43 = vsel %vm1282_vm3, %v1277_v32, -inf }
0x1618   :  { %v1260_v22 = vpop.xlane.xlu1 %1259  ;;  %v1287_v48 = vsel %vm1282_vm3, %v1278_v29, -inf }
0x1619   :  { %v1279_v30 = vadd.f32 %v1641_v25, %v1260_v22 }
0x161b   :  { %v1289_v37 = vsel %vm1282_vm3, %v1279_v30, -inf }
0x161c   :  { %v1290_v53 = vmax.f32 %v1284_v34, %v1289_v37  ;;  %v1723_v37 = vld [vmem:[%s2392_s7 + $0x10] sm:$0xff]  }
0x167a   :  { %v1245_v23 = vpop.xlane.xlu1 %1244 }
0x167b   :  { %v1274_v27 = vadd.f32 %v1641_v25, %v1245_v23 }
0x167d   :  { %v1283_v2 = vsel %vm1282_vm3, %v1274_v27, -inf }
0x167e   :  { %v1266_v31 = vpop.xlane.xlu1 %1265  ;;  %v1288_v45 = vmax.f32 %v1283_v2, %v1287_v48  ;;  %v1900_v48 = vmov 0.0  }
0x167f   :  { %v1281_v41 = vadd.f32 %v1641_v25, %v1266_v31  ;;  %v1263_v36 = vpop.xlane.xlu0 %1262  ;;  %1666 = vmatprep.subr.bf16.mxu0 %v1900_v48  ;;  %1678 = vmatprep.subr.bf16.mxu1 %v1900_v48 }
0x1680   :  { %v1280_v42 = vadd.f32 %v1641_v25, %v1263_v36  ;;  %v1295_v10 = vmax.f32 %v1288_v45, %v1290_v53  ;;  %v1722_v36 = vld [vmem:[%s2392_s7 + $0x18] sm:$0xff]   ;;  %1674 = vmatprep.mubr.msk.bf16.mxu0 %vm1901_vm4, %v1900_v48  ;;  %1686 = vmatprep.mubr.msk.bf16.mxu1 %vm1901_vm4, %v1900_v48 }
0x1681   :  { %v1293_v47 = vsel %vm1282_vm3, %v1281_v41, -inf  ;;  %1667 = vmatpush3.bf16.msra.mxu0 %v1722_v36 }
0x1682   :  { %v1294_v1 = vmax.f32 %v1286_v43, %v1293_v47  ;;  %v1291_v6 = vsel %vm1282_vm3, %v1280_v42, -inf  ;;  %1668 = vmatprep.subr.bf16.mxu0 %v1900_v48  ;;  %v1725_v43 = vld [vmem:[%s2392_s7] sm:$0xff]  }
0x1683   :  { %v1292_v8 = vmax.f32 %v1285_v4, %v1291_v6 }
0x1685   :  { %v1296_v11 = vmax.f32 %v1292_v8, %v1294_v1  ;;  %1669 = vmatpush3.bf16.msra.mxu0 %v1723_v37 }
0x1686   :  { %1670 = vmatprep.subr.bf16.mxu0 %v1900_v48 }
0x1687   :  { %v1297_v12 = vmax.f32 %v1295_v10, %v1296_v11 }
0x1689   :  { %1298 = vmax.xlane.f32.xlu0 %v1297_v12 }
0x1712   :  { %v1299_v13 = vpop.xlane.xlu0 %1298 }
0x1713   :  { %v1300_v50 = vrot.slane %v1299_v13, 4 }
0x1715   :  { %v1301_v52 = vmax.f32 %v1299_v13, %v1300_v50 }
0x1717   :  { %v1302_v38 = vrot.slane %v1301_v52, 2 }
0x1719   :  { %v1303_v54 = vmax.f32 %v1301_v52, %v1302_v38 }
0x171b   :  { %v1304_v56 = vrot.slane %v1303_v54, 1 }
0x171d   :  { %v1305_v58 = vmax.f32 %v1303_v54, %v1304_v56 }
0x171f   :  { %1690 = vpush %v1305_v58 }
0x1750   :  { %s1691_s5 = spop %1690 }
0x1751   :  { %v1307_v60 = vstv %s1691_s5 }
0x1752   :  { %v1308_v61 = vsub.f32 %v1274_v27, %v1307_v60  ;;  %v1309_v62 = vsub.f32 %v1275_v33, %v1307_v60  ;;  %v1310_v28 = vsub.f32 %v1276_v55, %v1307_v60  ;;  %v1311_v63 = vsub.f32 %v1277_v32, %v1307_v60 }
0x1753   :  { %v1312_v26 = vsub.f32 %v1278_v29, %v1307_v60  ;;  %v1313_v9 = vsub.f32 %v1279_v30, %v1307_v60  ;;  %v1314_v15 = vsub.f32 %v1280_v42, %v1307_v60  ;;  %v1315_v18 = vsub.f32 %v1281_v41, %v1307_v60  ;;  %v1724_v42 = vld [vmem:[%s2392_s7 + $0x8] sm:$0xff]  }
0x1754   :  { %v1316_v0 = vmul.f32 1.442695, %v1308_v61  ;;  %v1318_v3 = vmul.f32 1.442695, %v1309_v62  ;;  %v1320_v7 = vmul.f32 1.442695, %v1310_v28  ;;  %1671 = vmatpush3.bf16.msra.mxu0 %v1724_v42 }
0x1755   :  { %v1322_v14 = vmul.f32 1.442695, %v1311_v63  ;;  %v1324_v17 = vmul.f32 1.442695, %v1312_v26  ;;  %v1326_v16 = vmul.f32 1.442695, %v1313_v9  ;;  %1672 = vmatprep.subr.bf16.mxu0 %v1900_v48 }
0x1756   :  { %1874 = vpow2.f32 %v1316_v0  ;;  %v1328_v19 = vmul.f32 1.442695, %v1314_v15  ;;  %v1330_v20 = vmul.f32 1.442695, %v1315_v18  ;;  %v1642_v26 = vld [vmem:[%s2394_s8] ss:$0 sm:$0xff] }
0x1757   :  { %1876 = vpow2.f32 %v1318_v3  ;;  %v1648_v3 = vld [vmem:[%s2395_s9] ss:$0 sm:$0xff] }
0x1758   :  { %1878 = vpow2.f32 %v1320_v7  ;;  %1673 = vmatpush3.bf16.msra.mxu0 %v1725_v43  ;;  %v1649_v9 = vld [vmem:[%s2396_s10] ss:$0 sm:$0xff] }
0x1759   :  { %1880 = vpow2.f32 %v1322_v14 }
0x175a   :  { %1882 = vpow2.f32 %v1324_v17 }
0x175b   :  { %1884 = vpow2.f32 %v1326_v16 }
0x175c   :  { %1886 = vpow2.f32 %v1328_v19 }
0x175d   :  { %1888 = vpow2.f32 %v1330_v20 }
0x1763   :  { %v1875_v46 = vpop.eup %1874 }
0x1764   :  { %v1877_v21 = vpop.eup %1876  ;;  %1334 = vperm.xlu1 %1699, %v1875_v46  }
0x1765   :  { %v1380_v44 = vadd.f32 %v1877_v21, %v1875_v46  ;;  %1339 = vperm.xlu0 %1698, %v1877_v21   ;;  %v1879_v22 = vpop.eup %1878  ;;  %v1650_v46 = vld [vmem:[%s2397_s12] ss:$0 sm:$0xff] }
0x1766   :  { %v1881_v24 = vpop.eup %1880 }
0x1767   :  { %v1382_v25 = vadd.f32 %v1879_v22, %v1380_v44  ;;  %v1883_v23 = vpop.eup %1882 }
0x1768   :  { %1344 = vperm.xlu1 %1699, %v1879_v22   ;;  %v1885_v29 = vpop.eup %1884 }
0x1769   :  { %v1384_v27 = vadd.f32 %v1881_v24, %v1382_v25  ;;  %1354 = vperm.xlu0 %1698, %v1883_v23   ;;  %v1887_v32 = vpop.eup %1886 }
0x176a   :  { %v1889_v2 = vpop.eup %1888 }
0x176b   :  { %v1386_v30 = vadd.f32 %v1883_v23, %v1384_v27 }
0x176c   :  { %1349 = vperm.xlu1 %1699, %v1881_v24  }
0x176d   :  { %v1388_v33 = vadd.f32 %v1885_v29, %v1386_v30  ;;  %1364 = vperm.xlu0 %1698, %v1887_v32  }
0x176f   :  { %v1390_v55 = vadd.f32 %v1887_v32, %v1388_v33 }
0x1770   :  { %1359 = vperm.xlu1 %1699, %v1885_v29  }
0x1771   :  { %v1392_v31 = vadd.f32 %v1889_v2, %v1390_v55 }
0x1773   :  { %1890 = vrcp.f32 %v1392_v31 }
0x1774   :  { %1369 = vperm.xlu1 %1699, %v1889_v2  }
0x1780   :  { %v1891_v41 = vpop.eup %1890 }
0x1781   :  { %1397 = vperm.xlu0 %1698, %v1891_v41  }
0x17df   :  { %v1335_v45 = vpop.permute.xlu1 %1334 }
0x17e0   :  { %v1340_v47 = vpop.permute.xlu0 %1339  ;;  %v1372_v4 = vmul.f32 %v1335_v45, %v2316_v59 }
0x17e1   :  { %v1373_v34 = vmul.f32 %v1340_v47, %v2288_v35 }
0x17e3   :  { %v1345_v1 = vpop.permute.xlu1 %1344  ;;  %v1381_v53 = vadd.f32 %v1373_v34, %v1372_v4 }
0x17e4   :  { %v1374_v6 = vmul.f32 %v1345_v1, %v2293_v40  ;;  %v1355_v12 = vpop.permute.xlu0 %1354 }
0x17e5   :  { %v1376_v52 = vmul.f32 %v1355_v12, %v2299_v51  ;;  %v1727_v51 = vld [vmem:[%s2393_s11 + $0x10] sm:$0xff]  }
0x17e6   :  { %v1383_v11 = vadd.f32 %v1381_v53, %v1374_v6 }
0x17e7   :  { %v1350_v8 = vpop.permute.xlu1 %1349 }
0x17e8   :  { %v1375_v10 = vmul.f32 %v1350_v8, %v2291_v39  ;;  %v1365_v56 = vpop.permute.xlu0 %1364 }
0x17e9   :  { %v1378_v59 = vmul.f32 %v1365_v56, %v2322_v5  ;;  %v1729_v5 = vld [vmem:[%s2393_s11] sm:$0xff]  }
0x17ea   :  { %v1385_v13 = vadd.f32 %v1383_v11, %v1375_v10 }
0x17eb   :  { %v1360_v50 = vpop.permute.xlu1 %1359 }
0x17ec   :  { %v1387_v38 = vadd.f32 %v1385_v13, %v1376_v52  ;;  %v1377_v54 = vmul.f32 %v1360_v50, %v2297_v49  ;;  %v1726_v49 = vld [vmem:[%s2393_s11 + $0x18] sm:$0xff]  }
0x17ed   :  { %1679 = vmatpush3.bf16.msra.mxu1 %v1726_v49 }
0x17ee   :  { %v1389_v35 = vadd.f32 %v1387_v38, %v1377_v54  ;;  %1680 = vmatprep.subr.bf16.mxu1 %v1900_v48 }
0x17ef   :  { %v1370_v58 = vpop.permute.xlu1 %1369 }
0x17f0   :  { %v1379_v40 = vmul.f32 %v1370_v58, %v2318_v57  ;;  %v1391_v60 = vadd.f32 %v1389_v35, %v1378_v59  ;;  %v1728_v57 = vld [vmem:[%s2393_s11 + $0x8] sm:$0xff]  }
0x17f1   :  { %1681 = vmatpush3.bf16.msra.mxu1 %v1727_v51 }
0x17f2   :  { %v1393_v61 = vadd.f32 %v1391_v60, %v1379_v40  ;;  %1682 = vmatprep.subr.bf16.mxu1 %v1900_v48 }
0x17f5   :  { %1683 = vmatpush3.bf16.msra.mxu1 %v1728_v57 }
0x17f6   :  { %1684 = vmatprep.subr.bf16.mxu1 %v1900_v48 }
0x17f9   :  { %1685 = vmatpush3.bf16.msra.mxu1 %v1729_v5 }
0x17fc   :  { %v1398_v62 = vpop.permute.xlu0 %1397 }
0x17fd   :  { %v1400_v39 = vmul.f32 %v1398_v62, %v1393_v61 }
0x17ff   :  { %1892 = vtanh.f32 %v1400_v39 }
0x180c   :  { %v1893_v28 = vpop.eup %1892 }
0x180d   :  { %v1402_v63 = vpack.c.bf16 %v1893_v28, %v1893_v28 }
0x180f   :  { %1675 = vmatmul.mubr.msk.bf16.vlgmr.msra.gmra.mxu0 %vm269_vm2, %v1402_v63 }
0x18cf   :  { %v1479_v0 = vpop.f32.mrf.mxu0 }
0x18d0   :  { %v1480_v7 = vadd.f32 %v1642_v26, %v1479_v0 }
0x18d1   :  { %v1676_v14 = vpop.f32.mrf.mxu0 }
0x18d2   :  { %v1492_v15 = vmul.f32 %v1648_v3, %v1480_v7 }
0x18d3   :  { %v1482_v17 = vpop.f32.mrf.mxu0 }
0x18d4   :  { %v1500_v16 = vadd.f32 %v1649_v9, %v1492_v15 }
0x18d5   :  { %v1677_v18 = vpop.f32.mrf.mxu0 }
0x18d6   :  { %1894 = vtanh.f32 %v1500_v16 }
0x18e3   :  { %v1895_v19 = vpop.eup %1894 }
0x18e4   :  { %v1502_v20 = vpack.c.bf16 %v1895_v19, %v1895_v19 }
0x18e6   :  { %1687 = vmatmul.mubr.msk.bf16.vlgmr.msra.gmra.mxu1 %vm269_vm2, %v1502_v20 }
0x19a6   :  { %v1579_v21 = vpop.f32.mrf.mxu1 }
0x19a7   :  { %v1580_v44 = vadd.f32 %v1650_v46, %v1579_v21 }
0x19a8   :  { %v1688_v22 = vpop.f32.mrf.mxu1 }
0x19a9   :  { %1585 = vst [vmem:[%s2398_s13] sm:$0xff] %v1580_v44 }
0x19aa   :  { %v1582_v24 = vpop.f32.mrf.mxu1 }
0x19ac   :  { %v1689_v25 = vpop.f32.mrf.mxu1 }

</bundles_post_ra>
